<compile_context>
chip_gen: v5e
topology: v5e:2x2
jax: 0.10.0
libtpu: 0.0.40
codegen_flags: <defaults>
</compile_context>

<pallas_src>
import functools

import jax
import jax.numpy as jnp
import numpy as np
from jax.experimental import pallas as pl
from jax.experimental.pallas import tpu as pltpu


# ---------------------------------------------------------------------------
# Pallas kernel: one grid step = one batch row x s_tile slots.
# ---------------------------------------------------------------------------
def _generator_kernel(
    slot_ctrl_ref,            # (St, H)       f32
    onty_ref,                 # (St, N, H)    f32
    enc_ref,                  # (1, T, H)     f32
    mask_ref,                 # (1, 1, T)     f32 additive mask (0 / -1e30)
    w_att_ref, b_att_ref,     # (H, H), (1, H)
    w_i_ref, b_i_ref,         # (H, 3H), (1, 3H)  fused [r|z|n] input path
    w_h_ref, b_h_ref,         # (H, 3H), (1, 3H)  fused [r|z|n] hidden path
    w_gate_ref, b_gate_ref,   # (H, Gp), (1, Gp)  Gp = nb_gate padded to 128
    rank_ref,                 # (1, St, N)    out
    gate_ref,                 # (1, St, Gp)   out
    *,
    mxu_dtype,
):
    f32 = jnp.float32
    neg = f32(-1e30)

    slot_ctrl = slot_ctrl_ref[...]            # (St, H)
    onty = onty_ref[...]                      # (St, N, H)
    enc = enc_ref[0]                          # (T, H)
    mask = mask_ref[0]                        # (1, T)

    St, N, H = onty.shape
    M = St * N

    # cand_qry[s, n] = slot_ctrl[s] + onty[s, n]
    cand_qry = (slot_ctrl[:, None, :] + onty).reshape(M, H)

    enc_c = enc.astype(mxu_dtype)

    # Candidate attention scores (M, T): one "NT" MXU matmul (bf16 operands,
    # f32 accumulate), then additive length mask.
    sc = jax.lax.dot_general(
        cand_qry.astype(mxu_dtype), enc_c,
        dimension_numbers=(((1,), (1,)), ((), ())),
        preferred_element_type=f32)                       # (M, T)
    sc = sc + mask

    # Softmax over T.  Exact divide here: alpha feeds the rank matrix and the
    # top-3 selection, so no approx-reciprocal perturbation.
    mx = jnp.max(sc, axis=-1, keepdims=True)
    ex = jnp.exp(sc - mx)
    alpha = ex / jnp.sum(ex, axis=-1, keepdims=True)      # (M, T)

    # Candidate contexts: transpose-free (M, T) @ (T, H) matmul.
    ctx3 = jnp.dot(alpha.astype(mxu_dtype), enc_c,
                   preferred_element_type=f32).reshape(St, N, H)

    # Rank matrix: ONE pass over (St, N, H), reused below (not recomputed).
    rank_sn = jnp.sum(ctx3 * onty, axis=-1)               # (St, N)
    rank_ref[0] = rank_sn

    # Prior-slot attention scores against every candidate, computed once.
    q = jnp.dot(slot_ctrl, w_att_ref[...],
                preferred_element_type=f32) + b_att_ref[...]       # (St, H)
    dots = jnp.sum(ctx3 * q[:, None, :], axis=-1)                  # (St, N)

    # Top-3 by rank: iterative argmax (first-index tie-break), all on (St, N).
    # (torch.topk tie ordering may differ for exactly equal rank values.)
    iota_n = jax.lax.broadcasted_iota(jnp.int32, (St, N), 1)
    work = rank_sn
    sel_sc, sel_oh = [], []
    for _ in range(3):
        m_k = jnp.max(work, axis=-1, keepdims=True)
        first = jnp.min(jnp.where(work == m_k, iota_n, N),
                        axis=-1, keepdims=True)
        oh = iota_n == first                               # (St, N) one-hot
        sel_oh.append(oh)
        sel_sc.append(jnp.sum(jnp.where(oh, dots, 0.0),
                              axis=-1, keepdims=True))     # (St, 1)
        work = jnp.where(oh, neg, work)

    # 3-way softmax of the selected scores -> per-candidate weights; the prior
    # context is then ONE weighted reduction over ctx3.
    tmx = jnp.maximum(jnp.maximum(sel_sc[0], sel_sc[1]), sel_sc[2])
    te = [jnp.exp(s - tmx) for s in sel_sc]
    inv = pl.reciprocal(te[0] + te[1] + te[2], approx=True)   # tiny 3-way sum
    w_sel = (jnp.where(sel_oh[0], te[0], 0.0)
             + jnp.where(sel_oh[1], te[1], 0.0)
             + jnp.where(sel_oh[2], te[2], 0.0)) * inv         # (St, N)
    prior_ctx = jnp.sum(ctx3 * w_sel[:, :, None], axis=1)      # (St, H)

    # Single fused GRU step (input = slot_ctrl, h0 = prior_ctx), gates [r|z|n].
    gi = jnp.dot(slot_ctrl, w_i_ref[...],
                 preferred_element_type=f32) + b_i_ref[...]    # (St, 3H)
    gh = jnp.dot(prior_ctx, w_h_ref[...],
                 preferred_element_type=f32) + b_h_ref[...]    # (St, 3H)
    r = jax.nn.sigmoid(gi[:, 0:H] + gh[:, 0:H])
    z = jax.nn.sigmoid(gi[:, H:2 * H] + gh[:, H:2 * H])
    n = jnp.tanh(gi[:, 2 * H:3 * H] + r * gh[:, 2 * H:3 * H])
    h1 = (1.0 - z) * n + z * prior_ctx                         # (St, H)

    # all_gate_outputs[islot] = W_gate(hidden); lane-padded -> unmasked store.
    gate_ref[0] = jnp.dot(h1, w_gate_ref[...],
                          preferred_element_type=f32) + b_gate_ref[...]


# ---------------------------------------------------------------------------
# Wrapper: parameter plumbing + tiled, pipelined pallas_call.
# ---------------------------------------------------------------------------
def generator_forward(params, slot_ctrl, onty_repr, encoded_outputs,
                      encoded_lens, max_res_len, mem_vocab_size,
                      *, s_tile=None, mxu_dtype=jnp.bfloat16):
    S = slot_ctrl.shape[0]
    H = slot_ctrl.shape[-1]
    B, T, _ = encoded_outputs.shape
    N = onty_repr.shape[1]
    G = params['w_gate'].shape[1]
    assert N >= 3, "top-3 selection (torch.topk k=3) needs >= 3 candidates"

    # Slot tiling: the slot axis lands on the second-to-last dim of the
    # slot_ctrl / rank / gate blocks, so s_tile must be a multiple of 8
    # (or equal to S).  Shrink s_tile on v7x if the per-step estimate grows.
    if s_tile is None:
        s_tile = 8 if S % 8 == 0 else S
    assert S % s_tile == 0, "S must be a multiple of s_tile"
    assert s_tile % 8 == 0 or s_tile == S, "(8,128) layout rule on slot tiles"
    num_s = S // s_tile

    f32 = jnp.float32
    slot_ctrl2d = slot_ctrl.reshape(S, H).astype(f32)
    onty = onty_repr.astype(f32)
    enc = encoded_outputs.astype(f32)

    # Additive length mask precomputed once (no per-batch scalar loop inside
    # the kernel).  Finite -1e30: zero-length rows give a uniform alpha
    # instead of the reference's NaNs.
    lens = encoded_lens.reshape(B).astype(jnp.int32)
    t_pos = jnp.arange(T, dtype=jnp.int32)
    mask = jnp.where(t_pos[None, :] < lens[:, None], 0.0, -1e30)
    mask = mask.astype(f32).reshape(B, 1, T)

    # Fused GRU weights, torch gate order [r | z | n], stored as (in, out).
    w_i = jnp.concatenate([params['w_ir'], params['w_iz'], params['w_in']], 1)
    b_i = jnp.concatenate([params['b_ir'], params['b_iz'], params['b_in']], 1)
    w_h = jnp.concatenate([params['w_hr'], params['w_hz'], params['w_hn']], 1)
    b_h = jnp.concatenate([params['b_hr'], params['b_hz'], params['b_hn']], 1)

    # Pad the gate projection to a full 128-lane slab -> unmasked stores and
    # full MXU columns; the zero columns are sliced off below.
    Gp = ((G + 127) // 128) * 128
    w_gate_p = jnp.zeros((H, Gp), f32).at[:, :G].set(params['w_gate'].astype(f32))
    b_gate_p = jnp.zeros((1, Gp), f32).at[:, :G].set(params['b_gate'].astype(f32))

    const2 = lambda bi, si: (0, 0)
    in_specs = [
        pl.BlockSpec((s_tile, H), lambda bi, si: (si, 0)),        # slot_ctrl
        pl.BlockSpec((s_tile, N, H), lambda bi, si: (si, 0, 0)),  # onty_repr
        pl.BlockSpec((1, T, H), lambda bi, si: (bi, 0, 0)),       # encoded
        pl.BlockSpec((1, 1, T), lambda bi, si: (bi, 0, 0)),       # length mask
        pl.BlockSpec((H, H), const2), pl.BlockSpec((1, H), const2),
        pl.BlockSpec((H, 3 * H), const2), pl.BlockSpec((1, 3 * H), const2),
        pl.BlockSpec((H, 3 * H), const2), pl.BlockSpec((1, 3 * H), const2),
        pl.BlockSpec((H, Gp), const2), pl.BlockSpec((1, Gp), const2),
    ]
    out_specs = (
        pl.BlockSpec((1, s_tile, N), lambda bi, si: (bi, si, 0)),
        pl.BlockSpec((1, s_tile, Gp), lambda bi, si: (bi, si, 0)),
    )
    out_shape = (jax.ShapeDtypeStruct((B, S, N), f32),
                 jax.ShapeDtypeStruct((B, S, Gp), f32))

    rank_bsn, gate_bsg = pl.pallas_call(
        functools.partial(_generator_kernel, mxu_dtype=mxu_dtype),
        grid_spec=pltpu.PrefetchScalarGridSpec(
            num_scalar_prefetch=0,
            grid=(B, num_s),
            in_specs=in_specs,
            out_specs=out_specs),
        out_shape=out_shape,
        compiler_params=pltpu.CompilerParams(
            # Both axes independent -> shard across TCs on v7x megacore.
            dimension_semantics=("parallel", "parallel"),
            # Explicit scoped-VMEM budget (v5e default is only 16 MiB; v7x
            # physical is 64 MiB).  Toy tiles use a tiny fraction of this.
            vmem_limit_bytes=64 * 1024 * 1024),
    )(slot_ctrl2d, onty, enc, mask,
      params['w_att'].astype(f32), params['b_att'].astype(f32),
      w_i.astype(f32), b_i.astype(f32), w_h.astype(f32), b_h.astype(f32),
      w_gate_p, b_gate_p)

    all_rank = rank_bsn.transpose(1, 0, 2)               # (S, B, N)
    all_gate = gate_bsg[:, :, :G].transpose(1, 0, 2)     # (S, B, G)

    # Decoder breaks at wi == 0 -> point outputs stay zero, no words emitted.
    all_point_outputs = jnp.zeros((S, B, max_res_len, mem_vocab_size), f32)
    words_point_out = [[] for _ in range(S)]
    return all_point_outputs, all_gate, words_point_out, [], all_rank


# ---------------------------------------------------------------------------
# Pure-JAX reference (mirrors the PyTorch math) for a correctness check.
# `mxu_dtype` applies the same operand-cast policy as the kernel's two big
# matmuls so the bf16 path can be compared tightly.
# ---------------------------------------------------------------------------
def _softmax(x, axis):
    m = jnp.max(x, axis=axis, keepdims=True)
    e = jnp.exp(x - m)
    return e / jnp.sum(e, axis=axis, keepdims=True)


def reference_forward(params, slot_ctrl, onty_repr, enc, lens,
                      mxu_dtype=jnp.float32):
    S = slot_ctrl.shape[0]
    B, T, H = enc.shape
    f32 = jnp.float32
    enc_c = enc.astype(mxu_dtype)
    pos = jnp.arange(T)
    ranks, gates = [], []
    for s in range(S):
        sc_b = jnp.broadcast_to(slot_ctrl[s], (B, H)).astype(f32)
        onty = onty_repr[s]
        cand_qry = sc_b[:, None, :] + onty[None, :, :]          # (B, N, H)
        att = jnp.einsum('bnh,bth->bnt', cand_qry.astype(mxu_dtype), enc_c,
                         preferred_element_type=f32)
        att = jnp.where(pos[None, None, :] < lens[:, None, None],
                        att, -jnp.inf)
        alpha = _softmax(att, -1)
        cand_ctx = jnp.einsum('bnt,bth->bnh', alpha.astype(mxu_dtype), enc_c,
                              preferred_element_type=f32)
        rank = jnp.sum(cand_ctx * onty[None], axis=-1)
        _, topk_idx = jax.lax.top_k(rank, 3)
        topk_ctx = jnp.take_along_axis(cand_ctx, topk_idx[:, :, None], axis=1)
        q = sc_b @ params['w_att'] + params['b_att']
        topk_sc = jnp.einsum('bkh,bh->bk', topk_ctx, q)
        topk_alpha = _softmax(topk_sc, -1)
        prior = jnp.einsum('bk,bkh->bh', topk_alpha, topk_ctx)
        x, h0 = sc_b, prior
        r = jax.nn.sigmoid(x @ params['w_ir'] + params['b_ir']
                           + h0 @ params['w_hr'] + params['b_hr'])
        z = jax.nn.sigmoid(x @ params['w_iz'] + params['b_iz']
                           + h0 @ params['w_hz'] + params['b_hz'])
        n = jnp.tanh(x @ params['w_in'] + params['b_in']
                     + r * (h0 @ params['w_hn'] + params['b_hn']))
        h1 = (1.0 - z) * n + z * h0
        gates.append(h1 @ params['w_gate'] + params['b_gate'])
        ranks.append(rank)
    return jnp.stack(ranks, 0), jnp.stack(gates, 0)


if __name__ == "__main__":
    B, T, H = 2, 16, 32          # batch, encoded seq len, hidden_size
    S, N, G = 16, 8, 3           # slots, ontology candidates per slot, nb_gate
    max_res_len, mem_vocab_size = 4, 20

    key = jax.random.PRNGKey(0)
    ks = jax.random.split(key, 24)
    bound = 1.0 / np.sqrt(H)

    def uni(k, shape):
        return jax.random.uniform(k, shape, jnp.float32, -bound, bound)

    # Slot_emb ~ N(0, 0.1); slot_ctrl = domain_emb + slot_emb (dropout = eval).
    n_dom = 4
    slot_emb_w = 0.1 * jax.random.normal(ks[0], (n_dom + S, H), jnp.float32)
    dom_idx = jnp.arange(S) % n_dom
    val_idx = n_dom + jnp.arange(S)
    slot_ctrl = (slot_emb_w[dom_idx] + slot_emb_w[val_idx]).reshape(S, 1, H)

    # TODO(synk): onty_repr stands in for encoder.forward_batfirst over the
    # tokenized ontology strings (string/vocab side has no Pallas equivalent).
    onty_repr = jax.random.normal(ks[1], (S, N, H), jnp.float32)

    encoded_outputs = jax.random.normal(ks[2], (B, T, H), jnp.float32)
    encoded_lens = jnp.array([T, 10], dtype=jnp.int32)

    params = {
        'w_att': uni(ks[3], (H, H)), 'b_att': uni(ks[4], (1, H)),
        'w_ir': uni(ks[5], (H, H)), 'w_iz': uni(ks[6], (H, H)),
        'w_in': uni(ks[7], (H, H)), 'w_hr': uni(ks[8], (H, H)),
        'w_hz': uni(ks[9], (H, H)), 'w_hn': uni(ks[10], (H, H)),
        'b_ir': uni(ks[11], (1, H)), 'b_iz': uni(ks[12], (1, H)),
        'b_in': uni(ks[13], (1, H)), 'b_hr': uni(ks[14], (1, H)),
        'b_hz': uni(ks[15], (1, H)), 'b_hn': uni(ks[16], (1, H)),
        'w_gate': uni(ks[17], (H, G)), 'b_gate': uni(ks[18], (1, G)),
    }

    # --- exact-precision path: full structural check (rank + top-3 + GRU) ---
    outs = generator_forward(params, slot_ctrl, onty_repr, encoded_outputs,
                             encoded_lens, max_res_len, mem_vocab_size,
                             mxu_dtype=jnp.float32)
    all_point_outputs, all_gate, words_point_out, _, all_rank = outs
    jax.block_until_ready(all_gate)
    jax.block_until_ready(all_rank)

    ref_rank, ref_gate = reference_forward(params, slot_ctrl, onty_repr,
                                           encoded_outputs, encoded_lens,
                                           mxu_dtype=jnp.float32)
    np.testing.assert_allclose(np.asarray(all_rank), np.asarray(ref_rank),
                               rtol=1e-3, atol=1e-3)
    np.testing.assert_allclose(np.asarray(all_gate), np.asarray(ref_gate),
                               rtol=1e-3, atol=1e-3)

    # --- bf16-MXU production path: compare rank against a reference with the
    # same operand-cast policy (rank is continuous; the gate passes through
    # the discrete top-3 selection, so it is only sanity-checked here — the
    # exact path above already validates that logic). ---
    outs_bf = generator_forward(params, slot_ctrl, onty_repr, encoded_outputs,
                                encoded_lens, max_res_len, mem_vocab_size,
                                mxu_dtype=jnp.bfloat16)
    _, gate_bf, _, _, rank_bf = outs_bf
    jax.block_until_ready(gate_bf)
    jax.block_until_ready(rank_bf)
    ref_rank_bf, _ = reference_forward(params, slot_ctrl, onty_repr,
                                       encoded_outputs, encoded_lens,
                                       mxu_dtype=jnp.bfloat16)
    np.testing.assert_allclose(np.asarray(rank_bf), np.asarray(ref_rank_bf),
                               rtol=2e-2, atol=2e-2)
    assert np.all(np.isfinite(np.asarray(gate_bf)))
    assert gate_bf.shape == (S, B, G)

    assert all_point_outputs.shape == (S, B, max_res_len, mem_vocab_size)
    assert len(words_point_out) == S and all(len(w) == 0 for w in words_point_out)
    print("KERNEL_OK")
</pallas_src>

<mosaic_0001>
module attributes {stable_mosaic.version = 11 : i64} {
  func.func @_generator_kernel(%arg0: i32, %arg1: i32, %arg2: memref<8x32xf32, #tpu.memory_space<vmem>>, %arg3: memref<8x8x32xf32, #tpu.memory_space<vmem>>, %arg4: memref<1x16x32xf32, #tpu.memory_space<vmem>>, %arg5: memref<1x1x16xf32, #tpu.memory_space<vmem>>, %arg6: memref<32x32xf32, #tpu.memory_space<vmem>>, %arg7: memref<1x32xf32, #tpu.memory_space<vmem>>, %arg8: memref<32x96xf32, #tpu.memory_space<vmem>>, %arg9: memref<1x96xf32, #tpu.memory_space<vmem>>, %arg10: memref<32x96xf32, #tpu.memory_space<vmem>>, %arg11: memref<1x96xf32, #tpu.memory_space<vmem>>, %arg12: memref<32x128xf32, #tpu.memory_space<vmem>>, %arg13: memref<1x128xf32, #tpu.memory_space<vmem>>, %arg14: memref<1x8x8xf32, #tpu.memory_space<vmem>>, %arg15: memref<1x8x128xf32, #tpu.memory_space<vmem>>) attributes {dimension_semantics = [#tpu.dimension_semantics<parallel>, #tpu.dimension_semantics<parallel>], iteration_bounds = array<i64: 2, 2>, scalar_prefetch = 0 : i64, scratch_operands = 0 : i64, tpu.core_type = #tpu.core_type<tc>, window_params = [{transform_indices = @transform_0, window_bounds = array<i64: 8, 32>}, {transform_indices = @transform_1, window_bounds = array<i64: 8, 8, 32>}, {transform_indices = @transform_2, window_bounds = array<i64: 1, 16, 32>}, {transform_indices = @transform_3, window_bounds = array<i64: 1, 1, 16>}, {pipeline_mode = #tpu.pipeline_mode<synchronous>, transform_indices = @transform_4, window_bounds = array<i64: 32, 32>}, {pipeline_mode = #tpu.pipeline_mode<synchronous>, transform_indices = @transform_5, window_bounds = array<i64: 1, 32>}, {pipeline_mode = #tpu.pipeline_mode<synchronous>, transform_indices = @transform_6, window_bounds = array<i64: 32, 96>}, {pipeline_mode = #tpu.pipeline_mode<synchronous>, transform_indices = @transform_7, window_bounds = array<i64: 1, 96>}, {pipeline_mode = #tpu.pipeline_mode<synchronous>, transform_indices = @transform_8, window_bounds = array<i64: 32, 96>}, {pipeline_mode = #tpu.pipeline_mode<synchronous>, transform_indices = @transform_9, window_bounds = array<i64: 1, 96>}, {pipeline_mode = #tpu.pipeline_mode<synchronous>, transform_indices = @transform_10, window_bounds = array<i64: 32, 128>}, {pipeline_mode = #tpu.pipeline_mode<synchronous>, transform_indices = @transform_11, window_bounds = array<i64: 1, 128>}, {transform_indices = @transform_12, window_bounds = array<i64: 1, 8, 8>}, {transform_indices = @transform_13, window_bounds = array<i64: 1, 8, 128>}]} {
    %c0 = arith.constant 0 : index
    %c0_0 = arith.constant 0 : index
    %0 = vector.load %arg2[%c0, %c0_0] : memref<8x32xf32, #tpu.memory_space<vmem>>, vector<8x32xf32>
    %c0_1 = arith.constant 0 : index
    %c0_2 = arith.constant 0 : index
    %c0_3 = arith.constant 0 : index
    %1 = vector.load %arg3[%c0_1, %c0_2, %c0_3] : memref<8x8x32xf32, #tpu.memory_space<vmem>>, vector<8x8x32xf32>
    %c0_4 = arith.constant 0 : index
    %c0_5 = arith.constant 0 : index
    %c0_6 = arith.constant 0 : index
    %2 = vector.load %arg4[%c0_4, %c0_5, %c0_6] : memref<1x16x32xf32, #tpu.memory_space<vmem>>, vector<1x16x32xf32>
    %3 = vector.shape_cast %2 : vector<1x16x32xf32> to vector<16x32xf32>
    %c0_7 = arith.constant 0 : index
    %c0_8 = arith.constant 0 : index
    %c0_9 = arith.constant 0 : index
    %4 = vector.load %arg5[%c0_7, %c0_8, %c0_9] : memref<1x1x16xf32, #tpu.memory_space<vmem>>, vector<1x1x16xf32>
    %5 = vector.shape_cast %4 : vector<1x1x16xf32> to vector<1x16xf32>
    %6 = vector.shape_cast %0 : vector<8x32xf32> to vector<8x1x32xf32>
    %7 = vector.broadcast %6 : vector<8x1x32xf32> to vector<8x8x32xf32>
    %8 = arith.addf %7, %1 : vector<8x8x32xf32>
    %9 = vector.shape_cast %8 : vector<8x8x32xf32> to vector<64x32xf32>
    %cst = arith.constant dense<0.000000e+00> : vector<64x16xf32>
    %10 = tpu.matmul %9, %3, %cst {dimension_numbers = #tpu.dot_dimension_numbers<[1], [1], [0], [0], [0, 0, 1, 0], [], []>} : vector<64x32xf32>, vector<16x32xf32>, vector<64x16xf32> -> vector<64x16xf32>
    %11 = vector.broadcast %5 : vector<1x16xf32> to vector<64x16xf32>
    %12 = arith.addf %10, %11 : vector<64x16xf32>
    %cst_10 = arith.constant dense<0xFF800000> : vector<64xf32>
    %13 = vector.multi_reduction <maximumf>, %12, %cst_10 [1] : vector<64x16xf32> to vector<64xf32>
    %14 = vector.shape_cast %13 : vector<64xf32> to vector<64x1xf32>
    %15 = vector.broadcast %14 : vector<64x1xf32> to vector<64x16xf32>
    %16 = arith.subf %12, %15 : vector<64x16xf32>
    %17 = math.exp %16 : vector<64x16xf32>
    %cst_11 = arith.constant dense<0.000000e+00> : vector<64xf32>
    %18 = vector.multi_reduction <add>, %17, %cst_11 [1] : vector<64x16xf32> to vector<64xf32>
    %19 = vector.shape_cast %18 : vector<64xf32> to vector<64x1xf32>
    %20 = vector.broadcast %19 : vector<64x1xf32> to vector<64x16xf32>
    %21 = arith.divf %17, %20 : vector<64x16xf32>
    %cst_12 = arith.constant dense<0.000000e+00> : vector<64x32xf32>
    %22 = tpu.matmul %21, %3, %cst_12 {dimension_numbers = #tpu.dot_dimension_numbers<[1], [0], [0], [1], [0, 0, 1, 1], [], []>} : vector<64x16xf32>, vector<16x32xf32>, vector<64x32xf32> -> vector<64x32xf32>
    %23 = vector.shape_cast %22 : vector<64x32xf32> to vector<8x8x32xf32>
    %24 = arith.mulf %23, %1 : vector<8x8x32xf32>
    %cst_13 = arith.constant dense<0.000000e+00> : vector<8x8xf32>
    %25 = vector.multi_reduction <add>, %24, %cst_13 [2] : vector<8x8x32xf32> to vector<8x8xf32>
    %c0_14 = arith.constant 0 : index
    %c0_15 = arith.constant 0 : index
    %c0_16 = arith.constant 0 : index
    %26 = vector.load %arg14[%c0_14, %c0_15, %c0_16] : memref<1x8x8xf32, #tpu.memory_space<vmem>>, vector<1x8x8xf32>
    %27 = vector.shape_cast %26 : vector<1x8x8xf32> to vector<8x8xf32>
    %28 = vector.shape_cast %25 : vector<8x8xf32> to vector<1x8x8xf32>
    tpu.vector_store %arg14[%c0_14, %c0_15, %c0_16], %28 {strides = array<i32>} : memref<1x8x8xf32, #tpu.memory_space<vmem>>, vector<1x8x8xf32>,
    %c0_17 = arith.constant 0 : index
    %c0_18 = arith.constant 0 : index
    %29 = vector.load %arg6[%c0_17, %c0_18] : memref<32x32xf32, #tpu.memory_space<vmem>>, vector<32x32xf32>
    %cst_19 = arith.constant dense<0.000000e+00> : vector<8x32xf32>
    %30 = tpu.matmul %0, %29, %cst_19 {dimension_numbers = #tpu.dot_dimension_numbers<[1], [0], [0], [1], [0, 0, 1, 1], [], []>} : vector<8x32xf32>, vector<32x32xf32>, vector<8x32xf32> -> vector<8x32xf32>
    %c0_20 = arith.constant 0 : index
    %c0_21 = arith.constant 0 : index
    %31 = vector.load %arg7[%c0_20, %c0_21] : memref<1x32xf32, #tpu.memory_space<vmem>>, vector<1x32xf32>
    %32 = vector.broadcast %31 : vector<1x32xf32> to vector<8x32xf32>
    %33 = arith.addf %30, %32 : vector<8x32xf32>
    %34 = vector.shape_cast %33 : vector<8x32xf32> to vector<8x1x32xf32>
    %35 = vector.broadcast %34 : vector<8x1x32xf32> to vector<8x8x32xf32>
    %36 = arith.mulf %23, %35 : vector<8x8x32xf32>
    %cst_22 = arith.constant dense<0.000000e+00> : vector<8x8xf32>
    %37 = vector.multi_reduction <add>, %36, %cst_22 [2] : vector<8x8x32xf32> to vector<8x8xf32>
    %38 = tpu.iota {dimensions = array<i32: 1>} : vector<8x8xi32>
    %cst_23 = arith.constant dense<0xFF800000> : vector<8xf32>
    %39 = vector.multi_reduction <maximumf>, %25, %cst_23 [1] : vector<8x8xf32> to vector<8xf32>
    %40 = vector.shape_cast %39 : vector<8xf32> to vector<8x1xf32>
    %41 = vector.broadcast %40 : vector<8x1xf32> to vector<8x8xf32>
    %42 = arith.cmpf oeq, %25, %41 : vector<8x8xf32>
    %c8_i32 = arith.constant 8 : i32
    %43 = vector.broadcast %c8_i32 : i32 to vector<8x8xi32>
    %44 = arith.select %42, %38, %43 : vector<8x8xi1>, vector<8x8xi32>
    %cst_24 = arith.constant dense<2147483647> : vector<8xi32>
    %45 = vector.multi_reduction <minsi>, %44, %cst_24 [1] : vector<8x8xi32> to vector<8xi32>
    %46 = vector.shape_cast %45 : vector<8xi32> to vector<8x1xi32>
    %47 = vector.broadcast %46 : vector<8x1xi32> to vector<8x8xi32>
    %48 = arith.cmpi eq, %38, %47 : vector<8x8xi32>
    %cst_25 = arith.constant 0.000000e+00 : f32
    %49 = vector.broadcast %cst_25 : f32 to vector<8x8xf32>
    %50 = arith.select %48, %37, %49 : vector<8x8xi1>, vector<8x8xf32>
    %cst_26 = arith.constant dense<0.000000e+00> : vector<8xf32>
    %51 = vector.multi_reduction <add>, %50, %cst_26 [1] : vector<8x8xf32> to vector<8xf32>
    %52 = vector.shape_cast %51 : vector<8xf32> to vector<8x1xf32>
    %cst_27 = arith.constant -1.000000e+30 : f32
    %53 = vector.broadcast %cst_27 : f32 to vector<8x8xf32>
    %54 = arith.select %48, %53, %25 : vector<8x8xi1>, vector<8x8xf32>
    %cst_28 = arith.constant dense<0xFF800000> : vector<8xf32>
    %55 = vector.multi_reduction <maximumf>, %54, %cst_28 [1] : vector<8x8xf32> to vector<8xf32>
    %56 = vector.shape_cast %55 : vector<8xf32> to vector<8x1xf32>
    %57 = vector.broadcast %56 : vector<8x1xf32> to vector<8x8xf32>
    %58 = arith.cmpf oeq, %54, %57 : vector<8x8xf32>
    %c8_i32_29 = arith.constant 8 : i32
    %59 = vector.broadcast %c8_i32_29 : i32 to vector<8x8xi32>
    %60 = arith.select %58, %38, %59 : vector<8x8xi1>, vector<8x8xi32>
    %cst_30 = arith.constant dense<2147483647> : vector<8xi32>
    %61 = vector.multi_reduction <minsi>, %60, %cst_30 [1] : vector<8x8xi32> to vector<8xi32>
    %62 = vector.shape_cast %61 : vector<8xi32> to vector<8x1xi32>
    %63 = vector.broadcast %62 : vector<8x1xi32> to vector<8x8xi32>
    %64 = arith.cmpi eq, %38, %63 : vector<8x8xi32>
    %cst_31 = arith.constant 0.000000e+00 : f32
    %65 = vector.broadcast %cst_31 : f32 to vector<8x8xf32>
    %66 = arith.select %64, %37, %65 : vector<8x8xi1>, vector<8x8xf32>
    %cst_32 = arith.constant dense<0.000000e+00> : vector<8xf32>
    %67 = vector.multi_reduction <add>, %66, %cst_32 [1] : vector<8x8xf32> to vector<8xf32>
    %68 = vector.shape_cast %67 : vector<8xf32> to vector<8x1xf32>
    %cst_33 = arith.constant -1.000000e+30 : f32
    %69 = vector.broadcast %cst_33 : f32 to vector<8x8xf32>
    %70 = arith.select %64, %69, %54 : vector<8x8xi1>, vector<8x8xf32>
    %cst_34 = arith.constant dense<0xFF800000> : vector<8xf32>
    %71 = vector.multi_reduction <maximumf>, %70, %cst_34 [1] : vector<8x8xf32> to vector<8xf32>
    %72 = vector.shape_cast %71 : vector<8xf32> to vector<8x1xf32>
    %73 = vector.broadcast %72 : vector<8x1xf32> to vector<8x8xf32>
    %74 = arith.cmpf oeq, %70, %73 : vector<8x8xf32>
    %c8_i32_35 = arith.constant 8 : i32
    %75 = vector.broadcast %c8_i32_35 : i32 to vector<8x8xi32>
    %76 = arith.select %74, %38, %75 : vector<8x8xi1>, vector<8x8xi32>
    %cst_36 = arith.constant dense<2147483647> : vector<8xi32>
    %77 = vector.multi_reduction <minsi>, %76, %cst_36 [1] : vector<8x8xi32> to vector<8xi32>
    %78 = vector.shape_cast %77 : vector<8xi32> to vector<8x1xi32>
    %79 = vector.broadcast %78 : vector<8x1xi32> to vector<8x8xi32>
    %80 = arith.cmpi eq, %38, %79 : vector<8x8xi32>
    %cst_37 = arith.constant 0.000000e+00 : f32
    %81 = vector.broadcast %cst_37 : f32 to vector<8x8xf32>
    %82 = arith.select %80, %37, %81 : vector<8x8xi1>, vector<8x8xf32>
    %cst_38 = arith.constant dense<0.000000e+00> : vector<8xf32>
    %83 = vector.multi_reduction <add>, %82, %cst_38 [1] : vector<8x8xf32> to vector<8xf32>
    %84 = vector.shape_cast %83 : vector<8xf32> to vector<8x1xf32>
    %85 = arith.maximumf %52, %68 : vector<8x1xf32>
    %86 = arith.maximumf %85, %84 : vector<8x1xf32>
    %87 = arith.subf %52, %86 : vector<8x1xf32>
    %88 = math.exp %87 : vector<8x1xf32>
    %89 = arith.subf %68, %86 : vector<8x1xf32>
    %90 = math.exp %89 : vector<8x1xf32>
    %91 = arith.subf %84, %86 : vector<8x1xf32>
    %92 = math.exp %91 : vector<8x1xf32>
    %93 = arith.addf %88, %90 : vector<8x1xf32>
    %94 = arith.addf %93, %92 : vector<8x1xf32>
    %95 = tpu.reciprocal %94 {approx = true} : vector<8x1xf32> -> vector<8x1xf32>
    %cst_39 = arith.constant 0.000000e+00 : f32
    %96 = vector.shape_cast %88 : vector<8x1xf32> to vector<8x1xf32>
    %97 = vector.broadcast %96 : vector<8x1xf32> to vector<8x8xf32>
    %98 = vector.broadcast %cst_39 : f32 to vector<8x8xf32>
    %99 = arith.select %48, %97, %98 : vector<8x8xi1>, vector<8x8xf32>
    %cst_40 = arith.constant 0.000000e+00 : f32
    %100 = vector.shape_cast %90 : vector<8x1xf32> to vector<8x1xf32>
    %101 = vector.broadcast %100 : vector<8x1xf32> to vector<8x8xf32>
    %102 = vector.broadcast %cst_40 : f32 to vector<8x8xf32>
    %103 = arith.select %64, %101, %102 : vector<8x8xi1>, vector<8x8xf32>
    %104 = arith.addf %99, %103 : vector<8x8xf32>
    %cst_41 = arith.constant 0.000000e+00 : f32
    %105 = vector.shape_cast %92 : vector<8x1xf32> to vector<8x1xf32>
    %106 = vector.broadcast %105 : vector<8x1xf32> to vector<8x8xf32>
    %107 = vector.broadcast %cst_41 : f32 to vector<8x8xf32>
    %108 = arith.select %80, %106, %107 : vector<8x8xi1>, vector<8x8xf32>
    %109 = arith.addf %104, %108 : vector<8x8xf32>
    %110 = vector.broadcast %95 : vector<8x1xf32> to vector<8x8xf32>
    %111 = arith.mulf %109, %110 : vector<8x8xf32>
    %112 = vector.shape_cast %111 : vector<8x8xf32> to vector<8x8x1xf32>
    %113 = vector.broadcast %112 : vector<8x8x1xf32> to vector<8x8x32xf32>
    %114 = arith.mulf %23, %113 : vector<8x8x32xf32>
    %cst_42 = arith.constant dense<0.000000e+00> : vector<8x32xf32>
    %115 = vector.multi_reduction <add>, %114, %cst_42 [1] : vector<8x8x32xf32> to vector<8x32xf32>
    %c0_43 = arith.constant 0 : index
    %c0_44 = arith.constant 0 : index
    %116 = vector.load %arg8[%c0_43, %c0_44] : memref<32x96xf32, #tpu.memory_space<vmem>>, vector<32x96xf32>
    %cst_45 = arith.constant dense<0.000000e+00> : vector<8x96xf32>
    %117 = tpu.matmul %0, %116, %cst_45 {dimension_numbers = #tpu.dot_dimension_numbers<[1], [0], [0], [1], [0, 0, 1, 1], [], []>} : vector<8x32xf32>, vector<32x96xf32>, vector<8x96xf32> -> vector<8x96xf32>
    %c0_46 = arith.constant 0 : index
    %c0_47 = arith.constant 0 : index
    %118 = vector.load %arg9[%c0_46, %c0_47] : memref<1x96xf32, #tpu.memory_space<vmem>>, vector<1x96xf32>
    %119 = vector.broadcast %118 : vector<1x96xf32> to vector<8x96xf32>
    %120 = arith.addf %117, %119 : vector<8x96xf32>
    %c0_48 = arith.constant 0 : index
    %c0_49 = arith.constant 0 : index
    %121 = vector.load %arg10[%c0_48, %c0_49] : memref<32x96xf32, #tpu.memory_space<vmem>>, vector<32x96xf32>
    %cst_50 = arith.constant dense<0.000000e+00> : vector<8x96xf32>
    %122 = tpu.matmul %115, %121, %cst_50 {dimension_numbers = #tpu.dot_dimension_numbers<[1], [0], [0], [1], [0, 0, 1, 1], [], []>} : vector<8x32xf32>, vector<32x96xf32>, vector<8x96xf32> -> vector<8x96xf32>
    %c0_51 = arith.constant 0 : index
    %c0_52 = arith.constant 0 : index
    %123 = vector.load %arg11[%c0_51, %c0_52] : memref<1x96xf32, #tpu.memory_space<vmem>>, vector<1x96xf32>
    %124 = vector.broadcast %123 : vector<1x96xf32> to vector<8x96xf32>
    %125 = arith.addf %122, %124 : vector<8x96xf32>
    %126 = vector.extract_strided_slice %120 {offsets = [0, 0], sizes = [8, 32], strides = [1, 1]} : vector<8x96xf32> to vector<8x32xf32>
    %127 = vector.extract_strided_slice %125 {offsets = [0, 0], sizes = [8, 32], strides = [1, 1]} : vector<8x96xf32> to vector<8x32xf32>
    %128 = arith.addf %126, %127 : vector<8x32xf32>
    %129 = arith.negf %128 : vector<8x32xf32>
    %130 = math.exp %129 : vector<8x32xf32>
    %cst_53 = arith.constant 1.000000e+00 : f32
    %131 = vector.broadcast %cst_53 : f32 to vector<8x32xf32>
    %132 = arith.addf %131, %130 : vector<8x32xf32>
    %133 = arith.divf %131, %132 : vector<8x32xf32>
    %134 = vector.extract_strided_slice %120 {offsets = [0, 32], sizes = [8, 32], strides = [1, 1]} : vector<8x96xf32> to vector<8x32xf32>
    %135 = vector.extract_strided_slice %125 {offsets = [0, 32], sizes = [8, 32], strides = [1, 1]} : vector<8x96xf32> to vector<8x32xf32>
    %136 = arith.addf %134, %135 : vector<8x32xf32>
    %137 = arith.negf %136 : vector<8x32xf32>
    %138 = math.exp %137 : vector<8x32xf32>
    %cst_54 = arith.constant 1.000000e+00 : f32
    %139 = vector.broadcast %cst_54 : f32 to vector<8x32xf32>
    %140 = arith.addf %139, %138 : vector<8x32xf32>
    %141 = arith.divf %139, %140 : vector<8x32xf32>
    %142 = vector.extract_strided_slice %120 {offsets = [0, 64], sizes = [8, 32], strides = [1, 1]} : vector<8x96xf32> to vector<8x32xf32>
    %143 = vector.extract_strided_slice %125 {offsets = [0, 64], sizes = [8, 32], strides = [1, 1]} : vector<8x96xf32> to vector<8x32xf32>
    %144 = arith.mulf %133, %143 : vector<8x32xf32>
    %145 = arith.addf %142, %144 : vector<8x32xf32>
    %146 = math.tanh %145 : vector<8x32xf32>
    %cst_55 = arith.constant 1.000000e+00 : f32
    %147 = vector.broadcast %cst_55 : f32 to vector<8x32xf32>
    %148 = arith.subf %147, %141 : vector<8x32xf32>
    %149 = arith.mulf %148, %146 : vector<8x32xf32>
    %150 = arith.mulf %141, %115 : vector<8x32xf32>
    %151 = arith.addf %149, %150 : vector<8x32xf32>
    %c0_56 = arith.constant 0 : index
    %c0_57 = arith.constant 0 : index
    %152 = vector.load %arg12[%c0_56, %c0_57] : memref<32x128xf32, #tpu.memory_space<vmem>>, vector<32x128xf32>
    %cst_58 = arith.constant dense<0.000000e+00> : vector<8x128xf32>
    %153 = tpu.matmul %151, %152, %cst_58 {dimension_numbers = #tpu.dot_dimension_numbers<[1], [0], [0], [1], [0, 0, 1, 1], [], []>} : vector<8x32xf32>, vector<32x128xf32>, vector<8x128xf32> -> vector<8x128xf32>
    %c0_59 = arith.constant 0 : index
    %c0_60 = arith.constant 0 : index
    %154 = vector.load %arg13[%c0_59, %c0_60] : memref<1x128xf32, #tpu.memory_space<vmem>>, vector<1x128xf32>
    %155 = vector.broadcast %154 : vector<1x128xf32> to vector<8x128xf32>
    %156 = arith.addf %153, %155 : vector<8x128xf32>
    %c0_61 = arith.constant 0 : index
    %c0_62 = arith.constant 0 : index
    %c0_63 = arith.constant 0 : index
    %157 = vector.load %arg15[%c0_61, %c0_62, %c0_63] : memref<1x8x128xf32, #tpu.memory_space<vmem>>, vector<1x8x128xf32>
    %158 = vector.shape_cast %157 : vector<1x8x128xf32> to vector<8x128xf32>
    %159 = vector.shape_cast %156 : vector<8x128xf32> to vector<1x8x128xf32>
    tpu.vector_store %arg15[%c0_61, %c0_62, %c0_63], %159 {strides = array<i32>} : memref<1x8x128xf32, #tpu.memory_space<vmem>>, vector<1x8x128xf32>,
    return
  }
  func.func @transform_0(%arg0: i32, %arg1: i32) -> (i32, i32) {
    %c0_i32 = arith.constant 0 : i32
    %c0_i32_0 = arith.constant 0 : i32
    return %arg1, %c0_i32 : i32, i32
  }
  func.func @transform_1(%arg0: i32, %arg1: i32) -> (i32, i32, i32) {
    %c0_i32 = arith.constant 0 : i32
    %c0_i32_0 = arith.constant 0 : i32
    %c0_i32_1 = arith.constant 0 : i32
    return %arg1, %c0_i32, %c0_i32_0 : i32, i32, i32
  }
  func.func @transform_2(%arg0: i32, %arg1: i32) -> (i32, i32, i32) {
    %c0_i32 = arith.constant 0 : i32
    %c0_i32_0 = arith.constant 0 : i32
    %c0_i32_1 = arith.constant 0 : i32
    return %arg0, %c0_i32, %c0_i32_0 : i32, i32, i32
  }
  func.func @transform_3(%arg0: i32, %arg1: i32) -> (i32, i32, i32) {
    %c0_i32 = arith.constant 0 : i32
    %c0_i32_0 = arith.constant 0 : i32
    %c0_i32_1 = arith.constant 0 : i32
    return %arg0, %c0_i32, %c0_i32_0 : i32, i32, i32
  }
  func.func @transform_4(%arg0: i32, %arg1: i32) -> (i32, i32) {
    %c0_i32 = arith.constant 0 : i32
    %c0_i32_0 = arith.constant 0 : i32
    %c0_i32_1 = arith.constant 0 : i32
    return %c0_i32, %c0_i32_0 : i32, i32
  }
  func.func @transform_5(%arg0: i32, %arg1: i32) -> (i32, i32) {
    %c0_i32 = arith.constant 0 : i32
    %c0_i32_0 = arith.constant 0 : i32
    %c0_i32_1 = arith.constant 0 : i32
    return %c0_i32, %c0_i32_0 : i32, i32
  }
  func.func @transform_6(%arg0: i32, %arg1: i32) -> (i32, i32) {
    %c0_i32 = arith.constant 0 : i32
    %c0_i32_0 = arith.constant 0 : i32
    %c0_i32_1 = arith.constant 0 : i32
    return %c0_i32, %c0_i32_0 : i32, i32
  }
  func.func @transform_7(%arg0: i32, %arg1: i32) -> (i32, i32) {
    %c0_i32 = arith.constant 0 : i32
    %c0_i32_0 = arith.constant 0 : i32
    %c0_i32_1 = arith.constant 0 : i32
    return %c0_i32, %c0_i32_0 : i32, i32
  }
  func.func @transform_8(%arg0: i32, %arg1: i32) -> (i32, i32) {
    %c0_i32 = arith.constant 0 : i32
    %c0_i32_0 = arith.constant 0 : i32
    %c0_i32_1 = arith.constant 0 : i32
    return %c0_i32, %c0_i32_0 : i32, i32
  }
  func.func @transform_9(%arg0: i32, %arg1: i32) -> (i32, i32) {
    %c0_i32 = arith.constant 0 : i32
    %c0_i32_0 = arith.constant 0 : i32
    %c0_i32_1 = arith.constant 0 : i32
    return %c0_i32, %c0_i32_0 : i32, i32
  }
  func.func @transform_10(%arg0: i32, %arg1: i32) -> (i32, i32) {
    %c0_i32 = arith.constant 0 : i32
    %c0_i32_0 = arith.constant 0 : i32
    %c0_i32_1 = arith.constant 0 : i32
    return %c0_i32, %c0_i32_0 : i32, i32
  }
  func.func @transform_11(%arg0: i32, %arg1: i32) -> (i32, i32) {
    %c0_i32 = arith.constant 0 : i32
    %c0_i32_0 = arith.constant 0 : i32
    %c0_i32_1 = arith.constant 0 : i32
    return %c0_i32, %c0_i32_0 : i32, i32
  }
  func.func @transform_12(%arg0: i32, %arg1: i32) -> (i32, i32, i32) {
    %c0_i32 = arith.constant 0 : i32
    %c0_i32_0 = arith.constant 0 : i32
    return %arg0, %arg1, %c0_i32 : i32, i32, i32
  }
  func.func @transform_13(%arg0: i32, %arg1: i32) -> (i32, i32, i32) {
    %c0_i32 = arith.constant 0 : i32
    %c0_i32_0 = arith.constant 0 : i32
    return %arg0, %arg1, %c0_i32 : i32, i32, i32
  }
}

</mosaic_0001>

<bundles_post_ra>
// kernel: tpu_custom_call.1
= control target key start
LH: loop header
LB: loop body
LE: loop exit
PB: predicated region body
PF: predicated region fallthrough
CT: control target
= control target key end

     0   :  { %s3343_s0 = inlined_call_operand.hbm [shape: f32[16,32], index: 0, kind: input, shape index: {}]   ;;  %s3344_s1 = inlined_call_operand.hbm [shape: f32[16,8,32], index: 1, kind: input, shape index: {}]   ;;  %s3345_s2 = inlined_call_operand.hbm [shape: f32[2,16,32], index: 2, kind: input, shape index: {}]   ;;  %s3346_s3 = inlined_call_operand.vmem [shape: f32[2,1,16], index: 3, kind: input, shape index: {}]   ;;  %s3347_s4 = inlined_call_operand.hbm [shape: f32[32,32], index: 4, kind: input, shape index: {}]   ;;  %s3348_s5 = inlined_call_operand.vmem [shape: f32[1,32], index: 5, kind: input, shape index: {}]   ;;  %s3349_s6 = inlined_call_operand.hbm [shape: f32[32,96], index: 6, kind: input, shape index: {}]   ;;  %s3350_s7 = inlined_call_operand.vmem [shape: f32[1,96], index: 7, kind: input, shape index: {}]   ;;  %s3351_s8 = inlined_call_operand.hbm [shape: f32[32,96], index: 8, kind: input, shape index: {}]   ;;  %s3352_s9 = inlined_call_operand.vmem [shape: f32[1,96], index: 9, kind: input, shape index: {}]   ;;  %s3353_s10 = inlined_call_operand.hbm [shape: f32[32,128], index: 10, kind: input, shape index: {}]   ;;  %s3354_s11 = inlined_call_operand.vmem [shape: f32[1,128], index: 11, kind: input, shape index: {}]   ;;  %s3355_s12 = inlined_call_operand.vmem [shape: f32[2,16,8], index: 12, kind: output, shape index: {0}]   ;;  %s3356_s13 = inlined_call_operand.hbm [shape: f32[2,16,128], index: 13, kind: output, shape index: {1}]  }
   0x1   :  { %3380 = sst [smem:[#allocation35_spill]] %s3343_s0 }
   0x2   :  { %3381 = sst [smem:[#allocation36_spill]] %s3344_s1 }
   0x3   :  { %3382 = sst [smem:[#allocation37_spill]] %s3345_s2 }
   0x4   :  { %3383 = sst [smem:[#allocation38_spill]] %s3346_s3 }
   0x5   :  { %3384 = sst [smem:[#allocation39_spill]] %s3347_s4 }
   0x6   :  { %3385 = sst [smem:[#allocation40_spill]] %s3348_s5 }
   0x7   :  { %3386 = sst [smem:[#allocation41_spill]] %s3349_s6 }
   0x8   :  { %3387 = sst [smem:[#allocation42_spill]] %s3350_s7 }
   0x9   :  { %3388 = sst [smem:[#allocation43_spill]] %s3351_s8 }
   0xa   :  { %3389 = sst [smem:[#allocation44_spill]] %s3352_s9 }
   0xb   :  { %3390 = sst [smem:[#allocation45_spill]] %s3354_s11 }
   0xc   :  { %3391 = sst [smem:[#allocation46_spill]] %s3355_s12 }
   0xd   :  { %3392 = sst [smem:[#allocation47_spill]] %s3356_s13 }
   0xe   :  { %19 = vsyncpa [#allocation3], 0 }
   0xf   :  { %21 = vsyncpa [#allocation3 + $0x1], 0 }
  0x10   :  { %22 = vsyncpa [#allocation6], 0 }
  0x11   :  { %24 = vsyncpa [#allocation6 + $0x1], 0 }
  0x12   :  { %25 = vsyncpa [#allocation9], 0 }
  0x13   :  { %26 = vsyncpa [#allocation12], 0 }
  0x14   :  { %27 = vsyncpa [#allocation4], 0 }
  0x15   :  { %29 = vsyncpa [#allocation4 + $0x1], 0  ;;  %s2646_s25 = smov 0   ;;  %s2648_s26 = smov 0  }
  0x16   :  { %s2650_s27 = smov 0   ;;  %s2652_s28 = smov 0  }
  0x17   :  { %s2654_s29 = smov 0   ;;  %s2656_s30 = smov 0  }
  0x18   :  { %s2658_s14 = smov 0   ;;  %s2660_s15 = smov 0  }
  0x19   :  { %s2662_s16 = smov 0   ;;  %s2664_s17 = smov 0  }
  0x1a   :  { %s2666_s18 = smov 0   ;;  %s2668_s19 = smov 0  }
  0x1b   :  { %s2670_s20 = smov 0   ;;  %s2672_s21 = smov 0  }
  0x1c LB: > { %3393 = sst [smem:[#allocation21_spill]] %s2512_s25  ;;  %s2715_s22 = sadd.s32 4294967295, %s2564_s21   ;;  %s2564_s21 = sphi %s2672_s21, %s35_s21   ;;  %s2560_s20 = sphi %s2670_s20, %s3460_s20   ;;  %s2556_s19 = sphi %s2668_s19, %s3459_s19   ;;  %s2552_s18 = sphi %s2666_s18, %s3458_s18   ;;  %s2548_s17 = sphi %s2664_s17, %s3457_s17   ;;  %s2544_s16 = sphi %s2662_s16, %s3450_s16   ;;  %s2540_s15 = sphi %s2660_s15, %s3449_s15   ;;  %s2536_s14 = sphi %s2658_s14, %s3448_s14   ;;  %s2532_s30 = sphi %s2656_s30, %s3456_s30   ;;  %s2528_s29 = sphi %s2654_s29, %s3455_s29   ;;  %s2524_s28 = sphi %s2652_s28, %s3454_s28   ;;  %s2520_s27 = sphi %s2650_s27, %s3453_s27   ;;  %s2516_s26 = sphi %s2648_s26, %s3452_s26   ;;  %s2512_s25 = sphi %s2646_s25, %s3447_s25  }
  0x1d   : > { %3394 = sst [smem:[#allocation22_spill]] %s2516_s26  ;;  %s1890_s23 = sadd.s32 4294967294, %s2564_s21  }
  0x1e   : > { %3395 = sst [smem:[#allocation23_spill]] %s2540_s15  ;;  %p68_p0 = scmp.eq.s32.totalorder %s2715_s22, 0 }
  0x1f   : > { %3396 = sst [smem:[#allocation24_spill]] %s2544_s16  ;;  %p119_p1 = scmp.ne.s32.totalorder %s2528_s29, %s2524_s28 }
  0x20   : > { %3397 = sst [smem:[#allocation25_spill]] %s2548_s17  ;;  %p366_p2 = scmp.ne.s32.totalorder %s2520_s27, %s2516_s26 }
  0x21   : > { %3398 = sst [smem:[#allocation26_spill]] %s2552_s18  ;;  %p367_p3 = scmp.eq.s32.totalorder %s2715_s22, 3 }
  0x22   : > { %3399 = sst [smem:[#allocation27_spill]] %s2715_s22  ;;  %p2725_p4 = por %p119_p1, %p68_p0 }
  0x23   : > { %p372_p5 = scmp.ne.s32.totalorder %s2516_s26, %s2512_s25  ;;  %p2731_p6 = por %p367_p3, %p366_p2 }
  0x24   : > { %s3400_s24 = scalar_select %p2725_p4, 1, 0 }
  0x25   : > { %s3402_s11 = scalar_select %p2731_p6, 1, 0 }
  0x26   : > { %3401 = sst [smem:[#allocation28_spill]] %s3400_s24  ;;  %p373_p7 = scmp.eq.s32.totalorder %s1890_s23, 3 }
  0x27   : > { %3403 = sst [smem:[#allocation29_spill]] %s3402_s11  ;;  %p1891_p8 = scmp.ge.s32.totalorder %s2564_s21, 1 }
  0x28   : > { %p380_p9 = scmp.lt.s32.totalorder %s2564_s21, 5  ;;  %p2737_p10 = por %p373_p7, %p372_p5 }
  0x29   : > { %s3408_s4 = sld [smem:[#allocation39_spill]]  ;;  %s2566_s23 = smov [#allocation8]  }
  0x2a   : > { %s3404_s13 = scalar_select %p2737_p10, 1, 0 }
  0x2b   : > { %p2741_p11 = pnand %p1891_p8, %p380_p9  ;;  %s393_s11 = sshll.u32 %s2566_s23, 4  ;;  %s394_s11 = int_to_ptr.vmem [resolvable:$true] %s393_s11 }
  0x2c   : > { %3405 = sst [smem:[#allocation30_spill]] %s3404_s13  ;;  %s3365_s23 = smov 8  }
  0x2d   : > { %s3406_s28 = scalar_select %p2741_p11, 1, 0 }
  0x2e   : > { %p1974_p12 = pneg %p2741_p11  ;;  %s3410_s8 = sld [smem:[#allocation43_spill]] }
  0x2f   : > { %3407 = sst [smem:[#allocation31_spill]] %s3406_s28  ;;  %s391_s25 = sshll.u32 %s3408_s4, 4  ;;  %s392_s25 = int_to_ptr.hbm [resolvable:$true] %s391_s25 }
  0x30   : > { %p2752_p13 = pnand %p1974_p12, %p68_p0  ;;  %s3363_s4 = smov 128  }
  0x31   : > { %s2569_s5 = smov [#allocation11]   ;;  %s44_s7 = sadd.s32 1, %s2556_s19 }
  0x32   : > { %1977 = dma.hbm_to_vmem [thread:$0]  (!%p2752_p13), %s392_s25, 512, %s394_s11, [#allocation9], %s3363_s4, %s3363_s4, %s3365_s23  }
  0x33   : > { %s427_s26 = sshll.u32 %s2569_s5, 4  ;;  %p2770_p1 = scmp.ge.s32.totalorder %s44_s7, 2  ;;  %s428_s26 = int_to_ptr.vmem [resolvable:$true] %s427_s26 }
  0x34   : > { %s425_s9 = sshll.u32 %s3410_s8, 4  ;;  %s54_s11 = sadd.s32 1, %s2544_s16  ;;  %s426_s9 = int_to_ptr.hbm [resolvable:$true] %s425_s9 }
  0x35   : > { %1983 = dma.hbm_to_vmem [thread:$0]  (!%p2752_p13), %s426_s9, 512, %s428_s26, [#allocation12], %s3363_s4, %s3363_s4, %s3365_s23  }
  0x36   : > { %p61_p2 = scmp.ne.s32.totalorder %s2544_s16, %s2540_s15  ;;  %p62_p3 = scmp.eq.s32.totalorder %s2564_s21, 0 }
  0x37   : > { %s3462_s7 = smov (%p2770_p1, %s44_s7), 0  ;;  %p67_p7 = scmp.ne.s32.totalorder %s2540_s15, %s2536_s14 }
  0x38   : > { %3412 = sst [smem:[#allocation32_spill]] %s3462_s7  ;;  %p63_p5 = por %p62_p3, %p61_p2 }
  0x39   : > { %s2788_s5 = ssub.s32 %s2556_s19, %s3462_s7  ;;  %p2005_p8 = scmp.lt.s32.totalorder %s2564_s21, 4 }
  0x3a   : > { %p52_p9 = scmp.eq.s32.totalorder %s2788_s5, 0  ;;  %p2794_p12 = por %p68_p0, %p67_p7 }
  0x3b   : > { %s2799_s9 = sand.u32 1, %s2544_s16   ;;  %p2803_p10 = pnand %p2005_p8, %p63_p5 }
  0x3c   : > { %s3413_s25 = scalar_select %p2794_p12, 1, 0 }
  0x3d   : > { %s2808_s14 = scalar_select %p52_p9, %s2544_s16, %s54_s11  }
  0x3e   : > { %3414 = sst [smem:[#allocation33_spill]] %s3413_s25  ;;  %s480_s4 = sand.u32 1, %s2564_s21  }
  0x3f   : > { %3416 = sst [smem:[#allocation34_spill]] %s2808_s14  ;;  %s1899_s23 = sshll.u32 %s2799_s9, 6 }
  0x40   : > { %s1944_s7 = sshll.u32 %s2556_s19, 6  ;;  %s3417_s1 = sld [smem:[#allocation36_spill]] }
  0x41   : > { %s484_s18 = scalar_lea.vmem [#allocation5], %s1899_s23  ;;  %s3418_s6 = sld [smem:[#allocation41_spill]] }
  0x42   : > { %s492_s24 = sshll.u32 %s484_s18, 4  ;;  %s2819_s14 = scalar_lea.sflag [#allocation6], %s480_s4  ;;  %s493_s24 = int_to_ptr.vmem [resolvable:$true] %s492_s24 }
  0x43   : > { %s3419_s16 = smov 8   ;;  %s3420_s28 = smov 128  }
  0x44   : > { %s2570_s12 = smov [#allocation10]   ;;  %s442_s23 = sshll.u32 %s3353_s10, 4  ;;  %s443_s23 = int_to_ptr.hbm [resolvable:$true] %s442_s23 }
  0x45   : > { %s410_s17 = sshll.u32 %s2570_s12, 4  ;;  %s2571_s4 = smov [#allocation13]   ;;  %s411_s17 = int_to_ptr.vmem [resolvable:$true] %s410_s17 }
  0x46   : > { %s489_s3 = scalar_lea.hbm %s3417_s1, %s1944_s7  ;;  %s444_s15 = sshll.u32 %s2571_s4, 4  ;;  %s445_s15 = int_to_ptr.vmem [resolvable:$true] %s444_s15 }
  0x47   : > { %s490_s22 = sshll.u32 %s489_s3, 4  ;;  %s408_s11 = sshll.u32 %s3418_s6, 4  ;;  %s491_s22 = int_to_ptr.hbm [resolvable:$true] %s490_s22  ;;  %s409_s11 = int_to_ptr.hbm [resolvable:$true] %s408_s11 }
  0x48   : > { %1993 = dma.hbm_to_vmem [thread:$0]  (!%p2803_p10), %s491_s22, 1024, %s493_s24, %s2819_s14, %s3420_s28, %s3420_s28, %s3419_s16  }
  0x49   : > { %1980 = dma.hbm_to_vmem [thread:$0]  (!%p2752_p13), %s409_s11, 512, %s411_s17, [#allocation9], %s3420_s28, %s3420_s28, %s3419_s16  }
  0x4a   : > { %s1897_s22 = sshll.u32 %s2799_s9, 3  ;;  %s1898_s24 = sshll.u32 %s2556_s19, 3 }
  0x4b   : > { %1986 = dma.hbm_to_vmem [thread:$0]  (!%p2752_p13), %s443_s23, 512, %s445_s15, [#allocation12], %s3420_s28, %s3420_s28, %s3419_s16  }
  0x4c   : > { %s465_s7 = scalar_lea.vmem [#allocation2], %s1897_s22  ;;  %s3421_s0 = sld [smem:[#allocation35_spill]] }
  0x4d   : > { %s473_s25 = sshll.u32 %s465_s7, 4  ;;  %s462_s18 = scalar_lea.sflag [#allocation3], %s2799_s9  ;;  %s474_s25 = int_to_ptr.vmem [resolvable:$true] %s473_s25 }
  0x4e   : > { %s47_s13 = sadd.s32 1, %s2560_s20  ;;  %s106_s23 = sadd.s32 1, %s2532_s30 }
  0x4f   : > { %s3464_s13 = smov (!%p2770_p1, %s47_s13), %s2560_s20  ;;  %p113_p13 = scmp.ne.s32.totalorder %s2532_s30, %s2528_s29 }
  0x50   : > { %s356_s4 = sadd.s32 1, %s2520_s27  ;;  %p49_p2 = scmp.ge.s32.totalorder %s3464_s13, 2 }
  0x51   : > { %s504_s15 = sand.u32 1, %s2532_s30   ;;  %p2859_p5 = por %p113_p13, %p62_p3 }
  0x52   : > { %s469_s17 = scalar_lea.hbm %s3421_s0, %s1898_s24  ;;  %s1902_s9 = sshll.u32 %s504_s15, 4 }
  0x53   : > { %s471_s3 = sshll.u32 %s469_s17, 4  ;;  %s3466_s13 = smov (%p49_p2, %s3464_s13), 0  ;;  %s472_s3 = int_to_ptr.hbm [resolvable:$true] %s471_s3 }
  0x54   : > { %1990 = dma.hbm_to_vmem [thread:$0]  (!%p2803_p10), %s472_s3, 128, %s474_s25, %s462_s18  }
  0x55   : > { %s1945_s8 = sshll.u32 %s2560_s20, 4  ;;  %s103_s26 = ssub.s32 %s2560_s20, %s3466_s13 }
  0x56   : > { %s3423_s2 = sld [smem:[#allocation37_spill]]  ;;  %p104_p10 = scmp.eq.s32.totalorder %s103_s26, 0 }
  0x57   : > { %s353_s11 = sor.u32 %s103_s26, %s2788_s5  ;;  %s506_s18 = scalar_lea.vmem [#allocation7], %s1902_s9 }
  0x58   : > { %p354_p1 = scmp.eq.s32.totalorder %s353_s11, 0  ;;  %s514_s15 = sshll.u32 %s506_s18, 4  ;;  %s515_s15 = int_to_ptr.vmem [resolvable:$true] %s514_s15 }
  0x59   : > { %s2873_s17 = scalar_select %p104_p10, %s2532_s30, %s106_s23  }
  0x5a   : > { %s2876_s3 = scalar_select %p354_p1, %s2520_s27, %s356_s4  }
  0x5b   : > { %p1994_p3 = pnand %p2005_p8, %p2859_p5  ;;  %532 = sbr.rel (%p2741_p11) target bundleno = 3030 (0xbd6), region = 68 }
  0x5c   : > { %s511_s25 = scalar_lea.hbm %s3423_s2, %s1945_s8  ;;  %s3425_s5 = sld [smem:[#allocation23_spill]] (!%p2741_p11) }
  0x5d   : > { %s512_s12 = sshll.u32 %s511_s25, 4  ;;  %s513_s12 = int_to_ptr.hbm [resolvable:$true] %s512_s12 }
  0x5e   : > { %1996 = dma.hbm_to_vmem [thread:$0]  (!%p1994_p3), %s513_s12, 256, %s515_s15, %s2819_s14, %s3420_s28, %s3420_s28, %s3419_s16  }
  0x62   : > { %s534_s23 = sand.u32 1, %s3425_s5  }
  0x63   : > { %s1906_s24 = sshll.u32 %s534_s23, 3  ;;  %s535_s4 = scalar_lea.sflag [#allocation3], %s534_s23 }
  0x64   : > { %s2889_s7 = scalar_lea.vmem [#allocation2], %s1906_s24 }
  0x65   : > { %2487 = dma.done.wait (%p2794_p12), %s535_s4, 128  }
  0x66   : > { %2489 = vsyncadd (%p2794_p12), %s535_s4, 4294967168  ;;  %s3427_s22 = sld [smem:[#allocation27_spill]]  ;;  %s1907_s25 = sshll.u32 %s534_s23, 6 }
  0x67   : > { %s2896_s28 = scalar_lea.vmem [#allocation5], %s1907_s25 }
  0x6c   : > { %s544_s9 = sand.u32 1, %s3427_s22  }
  0x6d   : > { %s545_s16 = scalar_lea.sflag [#allocation6], %s544_s9 }
  0x6e   : > { %2491 = dma.done.wait (%p2794_p12), %s545_s16, 1024  }
  0x6f   : > { %2493 = vsyncadd (%p2794_p12), %s545_s16, 4294966272  ;;  %s556_s11 = sand.u32 1, %s2528_s29  }
  0x70   : > { %s1908_s12 = sshll.u32 %s556_s11, 4 }
  0x71   : > { %s558_s18 = scalar_lea.vmem [#allocation7], %s1908_s12 }
  0x72   : > { %2495 = dma.done.wait (%p2725_p4), %s545_s16, 256  }
  0x73   : > { %2497 = vsyncadd (%p2725_p4), %s545_s16, 4294967040 }
  0x74   : > { %2499 = dma.done.wait (%p68_p0), [#allocation9], 1024  }
  0x75   : > { %2501 = vsyncadd (%p68_p0), [#allocation9], 4294966272 }
  0x76   : > { %2503 = dma.done.wait (%p68_p0), [#allocation12], 1024  }
  0x77   : > { %2505 = vsyncadd (%p68_p0), [#allocation12], 4294966272  ;;  %s3429_s15 = sld [smem:[#allocation26_spill]]  ;;  %vm702_vm0 = vcmask 261120   ;;  %v665_v0 = vld [vmem:[%s558_s18 + $0x8] sm:$0xff]  ;;  %v2925_v2 = vld [vmem:[%s2896_s28] sm:$0xff] }
  0x78   : > { %v2920_v1 = vld [vmem:[%s2889_s7] sm:$0xff]  ;;  %1916 = vmatpush.xpose.msk.msra.mxu0 %vm702_vm0, %v665_v0  ;;  %1946 = vmatpush.xpose.msk.msra.mxu2 %vm702_vm0, %v665_v0  ;;  %v664_v5 = vld [vmem:[%s558_s18] sm:$0xff]  ;;  %v2930_v6 = vld [vmem:[%s2896_s28 + $0x28] sm:$0xff]  ;;  %s3430_s23 = sld [smem:[#allocation38_spill]]  ;;  %vm774_vm1 = vcmask 130048   ;;  %s2575_s12 = smov 96  }
  0x79   : > { %v675_v3 = vperm.slane %v2920_v1, 0  ;;  %v672_v4 = vrot.slane %v2920_v1, 5  ;;  %1005 = vmatpush.msra.mxu1 %v665_v0  ;;  %1948 = vmatpush.msra.mxu3 %v665_v0  ;;  %v668_v9 = vrot.slane %v2920_v1, 1  ;;  %v673_v10 = vrot.slane %v2920_v1, 6  ;;  %v2945_v14 = vld [vmem:[%s2896_s28 + $0x8] sm:$0xff]  ;;  %v2948_v15 = vld [vmem:[%s2896_s28 + $0x30] sm:$0xff] }
  0x7a   : > { %v669_v18 = vrot.slane %v2920_v1, 2  ;;  %v674_v19 = vrot.slane %v2920_v1, 7  ;;  %v2957_v22 = vld [vmem:[%s2896_s28 + $0x10] sm:$0xff]  ;;  %v2960_v23 = vld [vmem:[%s2896_s28 + $0x38] sm:$0xff]  ;;  %v670_v26 = vrot.slane %v2920_v1, 3  ;;  %v671_v30 = vrot.slane %v2920_v1, 4 }
  0x7b   : > { %v680_v7 = vperm.slane %v672_v4, 0  ;;  %v691_v8 = vadd.f32 %v675_v3, %v2925_v2  ;;  %1006 = vmatpush.msra.mxu1 %v664_v5  ;;  %1949 = vmatpush.msra.mxu3 %v664_v5  ;;  %v676_v12 = vperm.slane %v668_v9, 0  ;;  %v681_v13 = vperm.slane %v673_v10, 0  ;;  %v2968_v28 = vld [vmem:[%s2896_s28 + $0x18] sm:$0xff]  ;;  %v2974_v32 = vld [vmem:[%s2896_s28 + $0x20] sm:$0xff]  ;;  %s3433_s9 = sld [smem:[#allocation25_spill]] }
  0x7c   : > { %1917 = vmatpush.xpose.msk.msra.mxu0 %vm702_vm0, %v664_v5  ;;  %1947 = vmatpush.xpose.msk.msra.mxu2 %vm702_vm0, %v664_v5  ;;  %v677_v20 = vperm.slane %v669_v18, 0  ;;  %v682_v21 = vperm.slane %v674_v19, 0  ;;  %v678_v27 = vperm.slane %v670_v26, 0  ;;  %v679_v31 = vperm.slane %v671_v30, 0  ;;  %s3434_s18 = sld [smem:[#allocation46_spill]] }
  0x7d   : > { %p644_p11 = scmp.lt.s32.totalorder %s3429_s15, 1  ;;  %v696_v11 = vadd.f32 %v680_v7, %v2930_v6  ;;  %v692_v16 = vadd.f32 %v676_v12, %v2945_v14  ;;  %v697_v17 = vadd.f32 %v681_v13, %v2948_v15  ;;  %s3436_s22 = sld [smem:[#allocation44_spill]] }
  0x7e   : > { %v693_v24 = vadd.f32 %v677_v20, %v2957_v22  ;;  %v698_v25 = vadd.f32 %v682_v21, %v2960_v23  ;;  %v694_v29 = vadd.f32 %v678_v27, %v2968_v28  ;;  %v695_v33 = vadd.f32 %v679_v31, %v2974_v32  ;;  %s3437_s11 = sld [smem:[#allocation42_spill]] }
  0x7f   : > { %s2917_s8 = scalar_select %p644_p11, %s3429_s15, 1  ;;  %1918 = vmatmul.msk.f32.vlgmr.msra.gmra.mxu0 %vm702_vm0, %v691_v8  ;;  %1923 = vmatmul.msk.f32.vlgmr.msra.gmra.mxu2 %vm702_vm0, %v696_v11 }
  0x80   : > { %s3442_s1 = sld [smem:[#allocation45_spill]] }
  0x81   : > { %s646_s24 = scalar_lea.vmem %s3430_s23, %s2917_s8  ;;  %p649_p0 = scmp.lt.s32.totalorder %s3433_s9, 1 }
  0x82   : > { %v2140_v34 = vld [vmem:[%s646_s24] ss:$0 sm:$0xff]  ;;  %s1914_s16 = sshll.u32 %s2917_s8, 1  ;;  %s3435_s24 = sld [smem:[#allocation40_spill]] }
  0x83   : > { %s650_s25 = scalar_select %p649_p0, %s3433_s9, 1 }
  0x85   : > { %s652_s28 = sadd.s32 %s1914_s16, %s650_s25  ;;  %s2573_s25 = smov 64  }
  0x86   : > { %s1915_s14 = sshll.u32 %s652_s28, 3  ;;  %s2574_s16 = smov 32  }
  0x87   : > { %1919 = vmatmul.msk.f32.gmra.mxu0 %vm702_vm0, %v692_v16  ;;  %1924 = vmatmul.msk.f32.gmra.mxu2 %vm702_vm0, %v697_v17  ;;  %s654_s8 = scalar_lea.vmem %s3434_s18, %s1915_s14  ;;  %s3438_s18 = sld [smem:[#allocation22_spill]] }
  0x8d   : > { %s640_s5 = sand.u32 1, %s3438_s18  }
  0x8f   : > { %1920 = vmatmul.msk.f32.gmra.mxu0 %vm702_vm0, %v693_v24  ;;  %1925 = vmatmul.msk.f32.gmra.mxu2 %vm702_vm0, %v698_v25 }
  0x97   : > { %1921 = vmatmul.msk.f32.gmra.mxu0 %vm702_vm0, %v694_v29 }
  0x9f   : > { %1922 = vmatmul.msk.f32.gmra.mxu0 %vm702_vm0, %v695_v33 }
  0xfc   : > { %v750_v35 = vpop.f32.mrf.mxu0 }
  0xfd   : > { %v751_v36 = vadd.f32 %v2140_v34, %v750_v35 }
  0xff   : > { %v775_v37 = vsel %vm774_vm1, %v751_v36, -inf }
 0x100   : > { %776 = vmax.xlane.f32.xlu0 %v775_v37 }
 0x102   : > { %v765_v38 = vpop.f32.mrf.mxu2 }
 0x103   : > { %v766_v54 = vadd.f32 %v2140_v34, %v765_v38 }
 0x104   : > { %v753_v39 = vpop.f32.mrf.mxu0 }
 0x105   : > { %v754_v40 = vadd.f32 %v2140_v34, %v753_v39  ;;  %v790_v58 = vsel %vm774_vm1, %v766_v54, -inf }
 0x107   : > { %v778_v41 = vsel %vm774_vm1, %v754_v40, -inf }
 0x108   : > { %779 = vmax.xlane.f32.xlu0 %v778_v41 }
 0x10a   : > { %v768_v42 = vpop.f32.mrf.mxu2 }
 0x10b   : > { %v769_v43 = vadd.f32 %v2140_v34, %v768_v42 }
 0x10c   : > { %v756_v44 = vpop.f32.mrf.mxu0 }
 0x10d   : > { %v757_v45 = vadd.f32 %v2140_v34, %v756_v44  ;;  %v793_v46 = vsel %vm774_vm1, %v769_v43, -inf  ;;  %v1102_v44 = vld [vmem:[#allocation8 + $0x18] sm:$0xff] }
 0x10e   : > { %794 = vmax.xlane.f32.xlu2 %v793_v46  ;;  %1121 = vmatpush.msrb.mxu2 %v1102_v44  ;;  %v1100_v46 = vld [vmem:[#allocation8 + $0x8] sm:$0xff] }
 0x10f   : > { %v781_v47 = vsel %vm774_vm1, %v757_v45, -inf }
 0x110   : > { %782 = vmax.xlane.f32.xlu1 %v781_v47  ;;  %v1099_v47 = vld [vmem:[#allocation8] sm:$0xff] }
 0x112   : > { %v771_v48 = vpop.f32.mrf.mxu2 }
 0x113   : > { %v772_v49 = vadd.f32 %v2140_v34, %v771_v48 }
 0x114   : > { %v759_v50 = vpop.f32.mrf.mxu0 }
 0x115   : > { %v760_v51 = vadd.f32 %v2140_v34, %v759_v50  ;;  %v796_v52 = vsel %vm774_vm1, %v772_v49, -inf }
 0x116   : > { %797 = vmax.xlane.f32.xlu0 %v796_v52 }
 0x117   : > { %v784_v53 = vsel %vm774_vm1, %v760_v51, -inf }
 0x118   : > { %785 = vmax.xlane.f32.xlu1 %v784_v53 }
 0x11c   : > { %v762_v55 = vpop.f32.mrf.mxu0 }
 0x11d   : > { %v763_v56 = vadd.f32 %v2140_v34, %v762_v55 }
 0x11f   : > { %v787_v57 = vsel %vm774_vm1, %v763_v56, -inf }
 0x120   : > { %788 = vmax.xlane.f32.xlu2 %v787_v57  ;;  %791 = vmax.xlane.f32.xlu1 %v790_v58 }
 0x173   : > { %v777_v59 = vpop.xlane.xlu0 %776 }
 0x174   : > { %v799_v60 = vsub.f32 %v751_v36, %v777_v59 }
 0x176   : > { %v807_v61 = vmul.f32 1.442695, %v799_v60 }
 0x178   : > { %2145 = vpow2.f32 %v807_v61 }
 0x17b   : > { %v780_v62 = vpop.xlane.xlu0 %779 }
 0x17c   : > { %v800_v63 = vsub.f32 %v754_v40, %v780_v62 }
 0x17e   : > { %v2991_v0 = vpop.eup %2145  ;;  %v809_v3 = vmul.f32 1.442695, %v800_v63 }
 0x17f   : > { %v823_v4 = vsel %vm774_vm1, %v2991_v0, 0.0 }
 0x180   : > { %2147 = vpow2.f32 %v809_v3  ;;  %824 = vadd.xlane.f32.xlu2 %v823_v4 }
 0x181   : > { %v795_v5 = vpop.xlane.xlu2 %794 }
 0x182   : > { %v805_v7 = vsub.f32 %v769_v43, %v795_v5 }
 0x183   : > { %v783_v8 = vpop.xlane.xlu1 %782 }
 0x184   : > { %v819_v9 = vmul.f32 1.442695, %v805_v7  ;;  %v801_v10 = vsub.f32 %v757_v45, %v783_v8  ;;  %v1101_v45 = vld [vmem:[#allocation8 + $0x10] sm:$0xff] }
 0x185   : > { %1122 = vmatpush.msrb.mxu2 %v1101_v45 }
 0x186   : > { %v2995_v11 = vpop.eup %2147  ;;  %2149 = vpow2.f32 %v819_v9  ;;  %v811_v12 = vmul.f32 1.442695, %v801_v10 }
 0x187   : > { %v826_v13 = vsel %vm774_vm1, %v2995_v11, 0.0  ;;  %1123 = vmatpush.msrb.mxu2 %v1100_v46 }
 0x188   : > { %2151 = vpow2.f32 %v811_v12  ;;  %827 = vadd.xlane.f32.xlu0 %v826_v13 }
 0x189   : > { %v798_v16 = vpop.xlane.xlu0 %797  ;;  %1124 = vmatpush.msrb.mxu2 %v1099_v47 }
 0x18a   : > { %v806_v21 = vsub.f32 %v772_v49, %v798_v16  ;;  %1934 = vmatmul.msk.f32.vlgmr.msrb.gmra.mxu2 %vm702_vm0, %v2920_v1 }
 0x18b   : > { %v786_v17 = vpop.xlane.xlu1 %785 }
 0x18c   : > { %v2999_v18 = vpop.eup %2149  ;;  %v802_v19 = vsub.f32 %v760_v51, %v786_v17  ;;  %v821_v27 = vmul.f32 1.442695, %v806_v21 }
 0x18d   : > { %v841_v26 = vsel %vm774_vm1, %v2999_v18, 0.0 }
 0x18e   : > { %v3001_v20 = vpop.eup %2151  ;;  %v813_v24 = vmul.f32 1.442695, %v802_v19 }
 0x18f   : > { %v829_v25 = vsel %vm774_vm1, %v3001_v20, 0.0 }
 0x190   : > { %2153 = vpow2.f32 %v813_v24  ;;  %830 = vadd.xlane.f32.xlu1 %v829_v25  ;;  %842 = vadd.xlane.f32.xlu0 %v841_v26 }
 0x191   : > { %2155 = vpow2.f32 %v821_v27 }
 0x193   : > { %v789_v29 = vpop.xlane.xlu2 %788  ;;  %v792_v30 = vpop.xlane.xlu1 %791 }
 0x194   : > { %v803_v31 = vsub.f32 %v763_v56, %v789_v29  ;;  %v804_v33 = vsub.f32 %v766_v54, %v792_v30 }
 0x196   : > { %v3007_v34 = vpop.eup %2153  ;;  %v815_v35 = vmul.f32 1.442695, %v803_v31  ;;  %v817_v36 = vmul.f32 1.442695, %v804_v33 }
 0x197   : > { %v832_v37 = vsel %vm774_vm1, %v3007_v34, 0.0  ;;  %v3011_v38 = vpop.eup %2155 }
 0x198   : > { %2157 = vpow2.f32 %v815_v35  ;;  %833 = vadd.xlane.f32.xlu2 %v832_v37  ;;  %v844_v42 = vsel %vm774_vm1, %v3011_v38, 0.0 }
 0x199   : > { %2159 = vpow2.f32 %v817_v36 }
 0x19e   : > { %v3013_v39 = vpop.eup %2157 }
 0x19f   : > { %v3015_v40 = vpop.eup %2159  ;;  %v835_v41 = vsel %vm774_vm1, %v3013_v39, 0.0 }
 0x1a0   : > { %836 = vadd.xlane.f32.xlu1 %v835_v41  ;;  %v838_v43 = vsel %vm774_vm1, %v3015_v40, 0.0  ;;  %845 = vadd.xlane.f32.xlu2 %v844_v42 }
 0x1a1   : > { %839 = vadd.xlane.f32.xlu0 %v838_v43 }
 0x1f3   : > { %v825_v48 = vpop.xlane.xlu2 %824 }
 0x1f4   : > { %2161 = vrcp.f32 %v825_v48  ;;  %v858_v54 = vand.u32 2147483648, %v825_v48  ;;  %v856_v55 = vand.u32 2147483647, %v825_v48  ;;  %vm852_vm3 = vweird.f32 %v825_v48 }
 0x1f6   : > { %v859_v58 = vor.u32 1.1754944e-38, %v858_v54  ;;  %vm857_vm5 = vcmp.eq.f32.partialorder %v856_v55, 8.507059e+37 }
 0x1fa   : > { %v2162_v49 = vpop.eup %2161 }
 0x1fb   : > { %v848_v50 = vmul.f32 %v2162_v49, %v825_v48  ;;  %v828_v51 = vpop.xlane.xlu0 %827  ;;  %vm853_vm2 = vweird.f32 %v2162_v49 }
 0x1fc   : > { %2163 = vrcp.f32 %v828_v51  ;;  %vm854_vm4 = vmor %vm852_vm3, %vm853_vm2  ;;  %v873_v5 = vand.u32 2147483648, %v828_v51  ;;  %v871_v7 = vand.u32 2147483647, %v828_v51  ;;  %vm867_vm7 = vweird.f32 %v828_v51 }
 0x1fd   : > { %v849_v52 = vsub.f32 1.0, %v848_v50 }
 0x1fe   : > { %v874_v12 = vor.u32 1.1754944e-38, %v873_v5  ;;  %vm872_vm9 = vcmp.eq.f32.partialorder %v871_v7, 8.507059e+37 }
 0x1ff   : > { %v850_v53 = vmul.f32 %v2162_v49, %v849_v52 }
 0x201   : > { %v851_v56 = vadd.f32 %v2162_v49, %v850_v53 }
 0x202   : > { %v2164_v57 = vpop.eup %2163 }
 0x203   : > { %v863_v59 = vmul.f32 %v2164_v57, %v828_v51  ;;  %v831_v60 = vpop.xlane.xlu1 %830  ;;  %v843_v61 = vpop.xlane.xlu0 %842  ;;  %v855_v1 = vsel %vm854_vm4, %v2162_v49, %v851_v56  ;;  %vm868_vm6 = vweird.f32 %v2164_v57 }
 0x204   : > { %2165 = vrcp.f32 %v831_v60  ;;  %v860_v63 = vsel %vm857_vm5, %v859_v58, %v855_v1  ;;  %vm869_vm8 = vmor %vm867_vm7, %vm868_vm6  ;;  %v888_v27 = vand.u32 2147483648, %v831_v60  ;;  %v948_v30 = vand.u32 2147483648, %v843_v61 }
 0x205   : > { %v864_v62 = vsub.f32 1.0, %v863_v59  ;;  %2167 = vrcp.f32 %v843_v61  ;;  %v861_v3 = vmul.f32 %v2991_v0, %v860_v63  ;;  %vm882_vm11 = vweird.f32 %v831_v60 }
 0x206   : > { %v886_v33 = vand.u32 2147483647, %v831_v60  ;;  %v946_v35 = vand.u32 2147483647, %v843_v61  ;;  %v889_v45 = vor.u32 1.1754944e-38, %v888_v27  ;;  %vm942_vm14 = vweird.f32 %v843_v61 }
 0x207   : > { %v865_v4 = vmul.f32 %v2164_v57, %v864_v62  ;;  %1926 = vmatmul.msk.f32.vlgmr.msra.gmra.mxu1 %vm774_vm1, %v861_v3  ;;  %v949_v46 = vor.u32 1.1754944e-38, %v948_v30 }
 0x208   : > { %vm887_vm15 = vcmp.eq.f32.partialorder %v886_v33, 8.507059e+37  ;;  %vm947_vm2 = vcmp.eq.f32.partialorder %v946_v35, 8.507059e+37 }
 0x209   : > { %v866_v8 = vadd.f32 %v2164_v57, %v865_v4 }
 0x20a   : > { %v2166_v9 = vpop.eup %2165 }
 0x20b   : > { %v2168_v10 = vpop.eup %2167  ;;  %v878_v13 = vmul.f32 %v2166_v9, %v831_v60  ;;  %v834_v16 = vpop.xlane.xlu2 %833  ;;  %v870_v17 = vsel %vm869_vm8, %v2164_v57, %v866_v8  ;;  %vm883_vm10 = vweird.f32 %v2166_v9 }
 0x20c   : > { %v938_v19 = vmul.f32 %v2168_v10, %v843_v61  ;;  %2169 = vrcp.f32 %v834_v16  ;;  %v875_v0 = vsel %vm872_vm9, %v874_v12, %v870_v17  ;;  %vm3029_vm12 = vmor %vm882_vm11, %vm883_vm10  ;;  %vm943_vm13 = vweird.f32 %v2168_v10 }
 0x20d   : > { %v879_v21 = vsub.f32 1.0, %v878_v13  ;;  %v876_v25 = vmul.f32 %v2995_v11, %v875_v0  ;;  %v903_v49 = vand.u32 2147483648, %v834_v16  ;;  %vm944_vm3 = vmor %vm942_vm14, %vm943_vm13  ;;  %v901_v51 = vand.u32 2147483647, %v834_v16 }
 0x20e   : > { %v939_v24 = vsub.f32 1.0, %v938_v19  ;;  %vm897_vm5 = vweird.f32 %v834_v16 }
 0x20f   : > { %v880_v26 = vmul.f32 %v2166_v9, %v879_v21  ;;  %1927 = vmatmul.msk.f32.gmra.mxu1 %vm774_vm1, %v876_v25  ;;  %v904_v59 = vor.u32 1.1754944e-38, %v903_v49  ;;  %vm902_vm7 = vcmp.eq.f32.partialorder %v901_v51, 8.507059e+37 }
 0x210   : > { %v940_v29 = vmul.f32 %v2168_v10, %v939_v24 }
 0x211   : > { %v881_v31 = vadd.f32 %v2166_v9, %v880_v26 }
 0x212   : > { %v2170_v36 = vpop.eup %2169  ;;  %v941_v44 = vadd.f32 %v2168_v10, %v940_v29 }
 0x213   : > { %v893_v41 = vmul.f32 %v2170_v36, %v834_v16  ;;  %v3033_v42 = vpop.xlane.xlu1 %836  ;;  %v3035_v11 = vpop.xlane.xlu2 %845  ;;  %v885_v43 = vsel %vm3029_vm12, %v2166_v9, %v881_v31  ;;  %vm898_vm4 = vweird.f32 %v2170_v36 }
 0x214   : > { %2171 = vrcp.f32 %v3033_v42  ;;  %v3040_v47 = vpop.xlane.xlu0 %839  ;;  %v890_v50 = vsel %vm887_vm15, %v889_v45, %v885_v43  ;;  %v945_v54 = vsel %vm944_vm3, %v2168_v10, %v941_v44  ;;  %vm899_vm6 = vmor %vm897_vm5, %vm898_vm4  ;;  %v918_v5 = vand.u32 2147483648, %v3033_v42 }
 0x215   : > { %v894_v48 = vsub.f32 1.0, %v893_v41  ;;  %2173 = vrcp.f32 %v3035_v11  ;;  %v891_v53 = vmul.f32 %v3001_v20, %v890_v50  ;;  %v950_v55 = vsel %vm947_vm2, %v949_v46, %v945_v54 }
 0x216   : > { %2175 = vrcp.f32 %v3040_v47  ;;  %v951_v56 = vmul.f32 %v2999_v18, %v950_v55  ;;  %v963_v8 = vand.u32 2147483648, %v3035_v11  ;;  %v916_v12 = vand.u32 2147483647, %v3033_v42 }
 0x217   : > { %v895_v52 = vmul.f32 %v2170_v36, %v894_v48  ;;  %1928 = vmatmul.msk.f32.gmra.mxu1 %vm774_vm1, %v891_v53  ;;  %v961_v16 = vand.u32 2147483647, %v3035_v11  ;;  %vm912_vm10 = vweird.f32 %v3033_v42  ;;  %v919_v19 = vor.u32 1.1754944e-38, %v918_v5 }
 0x218   : > { %1932 = vmatmul.msk.f32.vlgmr.msra.gmra.mxu3 %vm774_vm1, %v951_v56  ;;  %vm957_vm11 = vweird.f32 %v3035_v11  ;;  %v964_v0 = vor.u32 1.1754944e-38, %v963_v8  ;;  %vm917_vm13 = vcmp.eq.f32.partialorder %v916_v12, 8.507059e+37  ;;  %v933_v31 = vand.u32 2147483648, %v3040_v47 }
 0x219   : > { %v896_v57 = vadd.f32 %v2170_v36, %v895_v52  ;;  %vm962_vm15 = vcmp.eq.f32.partialorder %v961_v16, 8.507059e+37  ;;  %vm927_vm3 = vweird.f32 %v3040_v47  ;;  %v931_v35 = vand.u32 2147483647, %v3040_v47 }
 0x21a   : > { %v2172_v58 = vpop.eup %2171  ;;  %v934_v37 = vor.u32 1.1754944e-38, %v933_v31 }
 0x21b   : > { %v2174_v60 = vpop.eup %2173  ;;  %v908_v61 = vmul.f32 %v2172_v58, %v3033_v42  ;;  %v900_v1 = vsel %vm899_vm6, %v2170_v36, %v896_v57  ;;  %vm913_vm8 = vweird.f32 %v2172_v58  ;;  %vm932_vm5 = vcmp.eq.f32.partialorder %v931_v35, 8.507059e+37 }
 0x21c   : > { %v2176_v20 = vpop.eup %2175  ;;  %v953_v62 = vmul.f32 %v2174_v60, %v3035_v11  ;;  %v905_v63 = vsel %vm902_vm7, %v904_v59, %v900_v1  ;;  %vm958_vm9 = vweird.f32 %v2174_v60  ;;  %vm914_vm12 = vmor %vm912_vm10, %vm913_vm8  ;;  %v1072_v57 = vlaneseq }
 0x21d   : > { %v909_v3 = vsub.f32 1.0, %v908_v61  ;;  %v923_v4 = vmul.f32 %v2176_v20, %v3040_v47  ;;  %v906_v18 = vmul.f32 %v3007_v34, %v905_v63  ;;  %vm959_vm14 = vmor %vm957_vm11, %vm958_vm9  ;;  %vm928_vm2 = vweird.f32 %v2176_v20 }
 0x21e   : > { %v954_v7 = vsub.f32 1.0, %v953_v62  ;;  %vm929_vm4 = vmor %vm927_vm3, %vm928_vm2  ;;  %v3111_v59 = vand.u32 127, %v1072_v57  ;;  %vm1084_vm6 = vcmask 1042434   ;;  %vm1086_vm7 = vcmask 1043459  }
 0x21f   : > { %v910_v9 = vmul.f32 %v2172_v58, %v909_v3  ;;  %v924_v10 = vsub.f32 1.0, %v923_v4  ;;  %1929 = vmatmul.msk.f32.gmra.mxu1 %vm774_vm1, %v906_v18  ;;  %vm1088_vm8 = vcmask 1044484   ;;  %vm1090_vm9 = vcmask 1045509  }
 0x220   : > { %v955_v13 = vmul.f32 %v2174_v60, %v954_v7  ;;  %vm1092_vm10 = vcmask 1046534   ;;  %vm1094_vm11 = vcmask 1047559  }
 0x221   : > { %v925_v17 = vmul.f32 %v2176_v20, %v924_v10  ;;  %v911_v34 = vadd.f32 %v2172_v58, %v910_v9 }
 0x222   : > { %v956_v21 = vadd.f32 %v2174_v60, %v955_v13 }
 0x223   : > { %v915_v24 = vsel %vm914_vm12, %v2172_v58, %v911_v34  ;;  %v926_v30 = vadd.f32 %v2176_v20, %v925_v17  ;;  %v3108_v58 = vshrl.u32 %v1072_v57, 7  ;;  %vm1097_vm12 = vcmask 64512  }
 0x224   : > { %v920_v25 = vsel %vm917_vm13, %v919_v19, %v915_v24  ;;  %v960_v26 = vsel %vm959_vm14, %v2174_v60, %v956_v21  ;;  %v2572_v24 = vmov 0  }
 0x225   : > { %v921_v27 = vmul.f32 %v3013_v39, %v920_v25  ;;  %v965_v29 = vsel %vm962_vm15, %v964_v0, %v960_v26  ;;  %v930_v36 = vsel %vm929_vm4, %v2176_v20, %v926_v30  ;;  %2133 = vset.pattern.permute.xlu1 %v3108_v58  ;;  %2135 = vset.pattern.permute.xlu0 %v2572_v24 }
 0x226   : > { %v966_v33 = vmul.f32 %v3011_v38, %v965_v29  ;;  %v935_v39 = vsel %vm932_vm5, %v934_v37, %v930_v36  ;;  %2134 = vset.pattern.permute.xlu2 %v2572_v24 }
 0x227   : > { %1930 = vmatmul.msk.f32.gmra.mxu1 %vm774_vm1, %v921_v27  ;;  %v936_v41 = vmul.f32 %v3015_v40, %v935_v39 }
 0x228   : > { %1933 = vmatmul.msk.f32.gmra.mxu3 %vm774_vm1, %v966_v33 }
 0x22f   : > { %1931 = vmatmul.msk.f32.gmra.mxu1 %vm774_vm1, %v936_v41  ;;  %vm1082_vm1 = vcmask 1041409  }
 0x284   : > { %v3068_v42 = vpop.f32.mrf.mxu1 }
 0x285   : > { %v1032_v38 = vmul.f32 %v3068_v42, %v2925_v2 }
 0x287   : > { %v1040_v11 = vsel %vm702_vm0, %v1032_v38, 0.0 }
 0x288   : > { %1041 = vadd.xlane.f32.xlu1 %v1040_v11 }
 0x28c   : > { %v3073_v43 = vpop.f32.mrf.mxu1 }
 0x28d   : > { %v1033_v44 = vmul.f32 %v3073_v43, %v2945_v14 }
 0x28f   : > { %v1043_v45 = vsel %vm702_vm0, %v1033_v44, 0.0 }
 0x290   : > { %1044 = vadd.xlane.f32.xlu2 %v1043_v45 }
 0x294   : > { %v3078_v46 = vpop.f32.mrf.mxu1 }
 0x295   : > { %v1034_v40 = vmul.f32 %v3078_v46, %v2957_v22 }
 0x297   : > { %v1046_v47 = vsel %vm702_vm0, %v1034_v40, 0.0 }
 0x298   : > { %1047 = vadd.xlane.f32.xlu0 %v1046_v47 }
 0x29b   : > { %v3088_v50 = vpop.f32.mrf.mxu3 }
 0x29c   : > { %v3083_v2 = vpop.f32.mrf.mxu1  ;;  %v1038_v14 = vmul.f32 %v3088_v50, %v2948_v15 }
 0x29d   : > { %v1035_v48 = vmul.f32 %v3083_v2, %v2968_v28 }
 0x29e   : > { %v1058_v53 = vsel %vm702_vm0, %v1038_v14, 0.0 }
 0x29f   : > { %v1049_v49 = vsel %vm702_vm0, %v1035_v48, 0.0 }
 0x2a0   : > { %1050 = vadd.xlane.f32.xlu1 %v1049_v49 }
 0x2a4   : > { %v3092_v51 = vpop.f32.mrf.mxu1 }
 0x2a5   : > { %v1036_v22 = vmul.f32 %v3092_v51, %v2974_v32 }
 0x2a7   : > { %v1052_v52 = vsel %vm702_vm0, %v1036_v22, 0.0 }
 0x2a8   : > { %1053 = vadd.xlane.f32.xlu2 %v1052_v52  ;;  %1059 = vadd.xlane.f32.xlu1 %v1058_v53 }
 0x2ab   : > { %v3098_v28 = vpop.f32.mrf.mxu3 }
 0x2ac   : > { %v1039_v54 = vmul.f32 %v3098_v28, %v2960_v23  ;;  %v3102_v55 = vpop.f32.mrf.mxu1 }
 0x2ad   : > { %v1037_v15 = vmul.f32 %v3102_v55, %v2930_v6 }
 0x2ae   : > { %v1061_v32 = vsel %vm702_vm0, %v1039_v54, 0.0 }
 0x2af   : > { %v1055_v56 = vsel %vm702_vm0, %v1037_v15, 0.0 }
 0x2b0   : > { %1062 = vadd.xlane.f32.xlu2 %v1061_v32  ;;  %1056 = vadd.xlane.f32.xlu0 %v1055_v56 }
 0x2c1   : > { %1217 = vperm.xlu1 %2133, %v3111_v59  }
 0x2c9   : > { %2136 = vset.pattern.permute.xlu1 %v2572_v24 }
 0x2fb   : > { %v1042_v23 = vpop.xlane.xlu1 %1041 }
 0x2fc   : > { %v1074_v63 = vperm.slane %v1042_v23, %v3111_v59 }
 0x303   : > { %v1045_v60 = vpop.xlane.xlu2 %1044 }
 0x304   : > { %v1075_v20 = vperm.slane %v1045_v60, %v3111_v59 }
 0x306   : > { %v1083_v18 = vsel %vm1082_vm1, %v1075_v20, %v1074_v63 }
 0x30b   : > { %v1048_v61 = vpop.xlane.xlu0 %1047 }
 0x30c   : > { %v1076_v62 = vperm.slane %v1048_v61, %v3111_v59 }
 0x30e   : > { %v1085_v7 = vsel %vm1084_vm6, %v1076_v62, %v1083_v18 }
 0x313   : > { %v1051_v6 = vpop.xlane.xlu1 %1050 }
 0x314   : > { %v1077_v3 = vperm.slane %v1051_v6, %v3111_v59 }
 0x316   : > { %v1087_v10 = vsel %vm1086_vm7, %v1077_v3, %v1085_v7 }
 0x31b   : > { %v3115_v1 = vpop.xlane.xlu2 %1053  ;;  %v1060_v5 = vpop.xlane.xlu1 %1059 }
 0x31c   : > { %v1078_v4 = vperm.slane %v3115_v1, %v3111_v59  ;;  %v1080_v16 = vperm.slane %v1060_v5, %v3111_v59 }
 0x31e   : > { %v1089_v13 = vsel %vm1088_vm8, %v1078_v4, %v1087_v10 }
 0x323   : > { %v1063_v8 = vpop.xlane.xlu2 %1062  ;;  %v1057_v9 = vpop.xlane.xlu0 %1056 }
 0x324   : > { %v1079_v12 = vperm.slane %v1057_v9, %v3111_v59  ;;  %v1081_v17 = vperm.slane %v1063_v8, %v3111_v59 }
 0x326   : > { %v1091_v34 = vsel %vm1090_vm9, %v1079_v12, %v1089_v13 }
 0x327   : > { %v1093_v19 = vsel %vm1092_vm10, %v1080_v16, %v1091_v34 }
 0x328   : > { %v3138_v21 = vsel %vm1094_vm11, %v1081_v17, %v1093_v19 }
 0x329   : > { %v1185_v0 = vsel %vm1097_vm12, %v3138_v21, -inf  ;;  %1098 = vst.msk [vmem:[%s654_s8] sm:$0xff] %vm1097_vm12, %v3138_v21  ;;  %s1940_s8 = sshll.u32 %s3429_s15, 1  ;;  %s1660_s15 = scalar_lea.sflag [#allocation4], %s640_s5 }
 0x32a   : > { %1186 = vmax.xlane.f32.xlu0 %v1185_v0  ;;  %s1673_s26 = sadd.s32 %s3433_s9, %s1940_s8 }
 0x333   : > { %v1218_v26 = vpop.permute.xlu1 %1217 }
 0x39d   : > { %v1187_v25 = vpop.xlane.xlu0 %1186 }
 0x39e   : > { %v1192_v27 = vperm.slane %v1187_v25, 3  ;;  %v1190_v29 = vperm.slane %v1187_v25, 1  ;;  %v1189_v30 = vperm.slane %v1187_v25, 0  ;;  %v1194_v36 = vperm.slane %v1187_v25, 5 }
 0x39f   : > { %v1191_v37 = vperm.slane %v1187_v25, 2  ;;  %v1196_v38 = vperm.slane %v1187_v25, 7  ;;  %v1193_v11 = vperm.slane %v1187_v25, 4  ;;  %v1195_v40 = vperm.slane %v1187_v25, 6 }
 0x3a0   : > { %vm1208_vm13 = vcmp.eq.f32.partialorder %v1051_v6, %v1192_v27  ;;  %vm1206_vm14 = vcmp.eq.f32.partialorder %v1045_v60, %v1190_v29  ;;  %vm1205_vm15 = vcmp.eq.f32.partialorder %v1042_v23, %v1189_v30  ;;  %vm1210_vm2 = vcmp.eq.f32.partialorder %v1057_v9, %v1194_v36 }
 0x3a1   : > { %v1222_v31 = vsel %vm1208_vm13, %v1218_v26, 8  ;;  %v1220_v33 = vsel %vm1206_vm14, %v1218_v26, 8  ;;  %v1219_v35 = vsel %vm1205_vm15, %v1218_v26, 8  ;;  %vm1207_vm3 = vcmp.eq.f32.partialorder %v1048_v61, %v1191_v37 }
 0x3a2   : > { %1237 = vperm.xlu1 %2136, %v1222_v31   ;;  %1231 = vperm.xlu0 %2135, %v1220_v33   ;;  %v1224_v39 = vsel %vm1210_vm2, %v1218_v26, 8  ;;  %v1221_v41 = vsel %vm1207_vm3, %v1218_v26, 8  ;;  %vm1212_vm4 = vcmp.eq.f32.partialorder %v1063_v8, %v1196_v38  ;;  %vm1209_vm5 = vcmp.eq.f32.partialorder %v3115_v1, %v1193_v11  ;;  %v2141_v33 = vld [vmem:[%s3435_s24] ss:$0 sm:$0xff]  ;;  %s1913_s24 = sshll.u32 %s640_s5, 3 }
 0x3a3   : > { %1228 = vperm.xlu2 %2134, %v1219_v35   ;;  %v1226_v44 = vsel %vm1212_vm4, %v1218_v26, 8  ;;  %v1223_v45 = vsel %vm1209_vm5, %v1218_v26, 8  ;;  %vm1211_vm13 = vcmp.eq.f32.partialorder %v1060_v5, %v1195_v40  ;;  %v1126_v35 = vpop.f32.mrf.mxu2  ;;  %s642_s2 = scalar_lea.vmem [#allocation14], %s1913_s24 }
 0x3a4   : > { %v1225_v47 = vsel %vm1211_vm13, %v1218_v26, 8  ;;  %v1127_v37 = vadd.f32 %v2141_v33, %v1126_v35  ;;  %s1677_s6 = sshll.u32 %s642_s2, 4  ;;  %s1678_s6 = int_to_ptr.vmem [resolvable:$true] %s1677_s6 }
 0x3a6   : > { %v1137_v38 = vperm.slane %v1127_v37, 0 }
 0x3a8   : > { %v1153_v11 = vmul.f32 %v1137_v38, %v3068_v42 }
 0x3aa   : > { %1243 = vperm.xlu1 %2136, %v1224_v39   ;;  %2137 = vset.pattern.permute.xlu0 %v3108_v58 }
 0x3ab   : > { %1234 = vperm.xlu2 %2134, %v1221_v41  }
 0x3b2   : > { %1249 = vperm.xlu1 %2136, %v1226_v44   ;;  %v1132_v44 = vrot.slane %v1127_v37, 3 }
 0x3b3   : > { %1240 = vperm.xlu2 %2134, %v1223_v45   ;;  %v1161_v45 = vsel %vm702_vm0, %v1153_v11, 0.0 }
 0x3b4   : > { %v1140_v40 = vperm.slane %v1132_v44, 0 }
 0x3ba   : > { %2138 = vset.pattern.permute.xlu1 %v3108_v58 }
 0x3bb   : > { %1246 = vperm.xlu2 %2134, %v1225_v47   ;;  %v1156_v47 = vmul.f32 %v1140_v40, %v3083_v2 }
 0x3c3   : > { %2139 = vset.pattern.permute.xlu2 %v3108_v58 }
 0x3fd   : > { %v1229_v48 = vpop.permute.xlu2 %1228 }
 0x3fe   : > { %v1251_v53 = vperm.slane %v1229_v48, %v3111_v59  ;;  %v1135_v48 = vrot.slane %v1127_v37, 6 }
 0x405   : > { %v1235_v49 = vpop.permute.xlu2 %1234 }
 0x406   : > { %v1253_v32 = vperm.slane %v1235_v49, %v3111_v59  ;;  %v1170_v49 = vsel %vm702_vm0, %v1156_v47, 0.0 }
 0x40d   : > { %v1241_v54 = vpop.permute.xlu2 %1240 }
 0x40e   : > { %v1255_v6 = vperm.slane %v1241_v54, %v3111_v59 }
 0x414   : > { %v1238_v14 = vpop.permute.xlu1 %1237  ;;  %v1232_v22 = vpop.permute.xlu0 %1231 }
 0x415   : > { %v1252_v52 = vperm.slane %v1232_v22, %v3111_v59  ;;  %v1254_v23 = vperm.slane %v1238_v14, %v3111_v59  ;;  %v1247_v61 = vpop.permute.xlu2 %1246  ;;  %v1143_v14 = vperm.slane %v1135_v48, 0 }
 0x416   : > { %v1257_v62 = vperm.slane %v1247_v61, %v3111_v59  ;;  %v1133_v61 = vrot.slane %v1127_v37, 4 }
 0x417   : > { %v1259_v15 = vsel %vm1082_vm1, %v1252_v52, %v1251_v53  ;;  %v1159_v22 = vmul.f32 %v1143_v14, %v3088_v50 }
 0x418   : > { %v1260_v56 = vsel %vm1084_vm6, %v1253_v32, %v1259_v15 }
 0x419   : > { %v1261_v60 = vsel %vm1086_vm7, %v1254_v23, %v1260_v56  ;;  %v1179_v52 = vsel %vm702_vm0, %v1159_v22, 0.0 }
 0x41a   : > { %v1262_v1 = vsel %vm1088_vm8, %v1255_v6, %v1261_v60 }
 0x41c   : > { %v1244_v57 = vpop.permute.xlu1 %1243 }
 0x41d   : > { %v1256_v58 = vperm.slane %v1244_v57, %v3111_v59  ;;  %v1130_v57 = vrot.slane %v1127_v37, 1 }
 0x41f   : > { %v1263_v20 = vsel %vm1090_vm9, %v1256_v58, %v1262_v1  ;;  %v1138_v60 = vperm.slane %v1130_v57, 0 }
 0x420   : > { %v1264_v4 = vsel %vm1092_vm10, %v1257_v62, %v1263_v20  ;;  %v1141_v20 = vperm.slane %v1133_v61, 0 }
 0x421   : > { %v1154_v6 = vmul.f32 %v1138_v60, %v3073_v43 }
 0x422   : > { %v1157_v62 = vmul.f32 %v1141_v20, %v3092_v51 }
 0x423   : > { %v1164_v1 = vsel %vm702_vm0, %v1154_v6, 0.0 }
 0x424   : > { %v1250_v63 = vpop.permute.xlu1 %1249 }
 0x425   : > { %v1258_v3 = vperm.slane %v1250_v63, %v3111_v59  ;;  %v1136_v63 = vrot.slane %v1127_v37, 7 }
 0x427   : > { %v1265_v18 = vsel %vm1094_vm11, %v1258_v3, %v1264_v4  ;;  %v1173_v3 = vsel %vm702_vm0, %v1157_v62, 0.0  ;;  %v1144_v4 = vperm.slane %v1136_v63, 0 }
 0x428   : > { %v1266_v5 = vsel %vm1097_vm12, %v1265_v18, 2147483647 }
 0x429   : > { %v1268_v7 = vshra.s32 %v1266_v5, 16  ;;  %v1267_v9 = vand.u32 65535, %v1266_v5  ;;  %v1160_v18 = vmul.f32 %v1144_v4, %v3098_v28 }
 0x42b   : > { %v1270_v8 = vcvt.s32.f32 %v1268_v7  ;;  %v1269_v12 = vcvt.s32.f32 %v1267_v9  ;;  %v1182_v5 = vsel %vm702_vm0, %v1160_v18, 0.0 }
 0x42d   : > { %1271 = vmin.xlane.f32.xlu0 %v1270_v8 }
 0x4a0   : > { %v1272_v10 = vpop.xlane.xlu0 %1271 }
 0x4a1   : > { %vm1273_vm14 = vcmp.eq.f32.partialorder %v1270_v8, %v1272_v10  ;;  %v1278_v16 = vcvt.f32.s32 %v1272_v10  ;;  %v1131_v10 = vrot.slane %v1127_v37, 2 }
 0x4a2   : > { %v1274_v13 = vsel %vm1273_vm14, %v1269_v12, inf }
 0x4a3   : > { %1275 = vmin.xlane.f32.xlu2 %v1274_v13  ;;  %v1279_v34 = vshll.u32 %v1278_v16, 16  ;;  %v1139_v16 = vperm.slane %v1131_v10, 0 }
 0x516   : > { %v1276_v17 = vpop.xlane.xlu2 %1275 }
 0x517   : > { %v1277_v19 = vcvt.f32.s32 %v1276_v17  ;;  %v1134_v17 = vrot.slane %v1127_v37, 5 }
 0x519   : > { %v3164_v0 = vadd.s32 %v1279_v34, %v1277_v19  ;;  %v1155_v34 = vmul.f32 %v1139_v16, %v3078_v46  ;;  %v1142_v19 = vperm.slane %v1134_v17, 0 }
 0x51b   : > { %vm1281_vm15 = vcmp.eq.s32.totalorder %v3111_v59, %v3164_v0 }
 0x51c   : > { %v1310_v24 = vsel %vm1281_vm15, -1e+30, %v3138_v21 }
 0x51d   : > { %v1311_v25 = vsel %vm1097_vm12, %v1310_v24, -inf }
 0x51e   : > { %1312 = vmax.xlane.f32.xlu1 %v1311_v25  ;;  %v1158_v25 = vmul.f32 %v1142_v19, %v3102_v55 }
 0x591   : > { %v1313_v26 = vpop.xlane.xlu1 %1312 }
 0x592   : > { %vm1314_vm2 = vcmp.eq.f32.partialorder %v1310_v24, %v1313_v26  ;;  %v1176_v26 = vsel %vm702_vm0, %v1158_v25, 0.0 }
 0x593   : > { %v1315_v27 = vsel %vm1314_vm2, %v3111_v59, 8 }
 0x594   : > { %v1316_v29 = vsel %vm1097_vm12, %v1315_v27, 2147483647 }
 0x595   : > { %v1318_v30 = vshra.s32 %v1316_v29, 16  ;;  %v1317_v36 = vand.u32 65535, %v1316_v29 }
 0x597   : > { %v1320_v31 = vcvt.s32.f32 %v1318_v30  ;;  %v1319_v39 = vcvt.s32.f32 %v1317_v36 }
 0x599   : > { %1321 = vmin.xlane.f32.xlu2 %v1320_v31 }
 0x60c   : > { %v1322_v21 = vpop.xlane.xlu2 %1321 }
 0x60d   : > { %vm1323_vm3 = vcmp.eq.f32.partialorder %v1320_v31, %v1322_v21  ;;  %v1328_v53 = vcvt.f32.s32 %v1322_v21 }
 0x60e   : > { %v1324_v41 = vsel %vm1323_vm3, %v1319_v39, inf }
 0x60f   : > { %1325 = vmin.xlane.f32.xlu0 %v1324_v41  ;;  %v1329_v15 = vshll.u32 %v1328_v53, 16 }
 0x617   : > { %1162 = vadd.xlane.f32.xlu0 %v1161_v45 }
 0x61f   : > { %1171 = vadd.xlane.f32.xlu0 %v1170_v49 }
 0x627   : > { %1180 = vadd.xlane.f32.xlu0 %v1179_v52 }
 0x682   : > { %v1326_v54 = vpop.xlane.xlu0 %1325 }
 0x683   : > { %v1327_v32 = vcvt.f32.s32 %v1326_v54 }
 0x685   : > { %v3184_v56 = vadd.s32 %v1329_v15, %v1327_v32 }
 0x687   : > { %vm1331_vm4 = vcmp.eq.s32.totalorder %v3111_v59, %v3184_v56 }
 0x688   : > { %v1336_v23 = vsel %vm1331_vm4, -1e+30, %v1310_v24  ;;  %v1167_v24 = vsel %vm702_vm0, %v1155_v34, 0.0 }
 0x689   : > { %v1337_v58 = vsel %vm1097_vm12, %v1336_v23, -inf }
 0x68a   : > { %1338 = vmax.xlane.f32.xlu1 %v1337_v58  ;;  %v1163_v27 = vpop.xlane.xlu0 %1162 }
 0x68b   : > { %v1290_v41 = vperm.slane %v1163_v27, %v3111_v59 }
 0x692   : > { %1165 = vadd.xlane.f32.xlu1 %v1164_v1  ;;  %v1172_v36 = vpop.xlane.xlu0 %1171 }
 0x693   : > { %v1293_v45 = vperm.slane %v1172_v36, %v3111_v59 }
 0x69a   : > { %1174 = vadd.xlane.f32.xlu1 %v1173_v3  ;;  %v1181_v40 = vpop.xlane.xlu0 %1180 }
 0x69b   : > { %v1296_v52 = vperm.slane %v1181_v40, %v3111_v59  ;;  %v1533_v40 = vld [vmem:[#allocation11 + $0x18] sm:$0xff] }
 0x69c   : > { %1567 = vmatpush.msra.mxu2 %v1533_v40 }
 0x6a2   : > { %1183 = vadd.xlane.f32.xlu1 %v1182_v5 }
 0x6fd   : > { %v1339_v7 = vpop.xlane.xlu1 %1338 }
 0x6fe   : > { %vm1340_vm5 = vcmp.eq.f32.partialorder %v1336_v23, %v1339_v7 }
 0x6ff   : > { %v1341_v8 = vsel %vm1340_vm5, %v3111_v59, 8 }
 0x700   : > { %v1342_v9 = vsel %vm1097_vm12, %v1341_v8, 2147483647 }
 0x701   : > { %v1344_v12 = vshra.s32 %v1342_v9, 16  ;;  %v1343_v30 = vand.u32 65535, %v1342_v9 }
 0x703   : > { %v1346_v13 = vcvt.s32.f32 %v1344_v12  ;;  %v1345_v33 = vcvt.s32.f32 %v1343_v30 }
 0x705   : > { %1347 = vmin.xlane.f32.xlu2 %v1346_v13  ;;  %v1166_v29 = vpop.xlane.xlu1 %1165 }
 0x706   : > { %v1291_v21 = vperm.slane %v1166_v29, %v3111_v59 }
 0x708   : > { %v1298_v11 = vsel %vm1082_vm1, %v1291_v21, %v1290_v41 }
 0x70d   : > { %1168 = vadd.xlane.f32.xlu2 %v1167_v24  ;;  %v1175_v37 = vpop.xlane.xlu1 %1174 }
 0x70e   : > { %v1294_v48 = vperm.slane %v1175_v37, %v3111_v59 }
 0x715   : > { %1177 = vadd.xlane.f32.xlu2 %v1176_v26  ;;  %v1184_v49 = vpop.xlane.xlu1 %1183 }
 0x716   : > { %v1297_v54 = vperm.slane %v1184_v49, %v3111_v59  ;;  %v1532_v49 = vld [vmem:[#allocation11 + $0x10] sm:$0xff] }
 0x717   : > { %1568 = vmatpush.msra.mxu2 %v1532_v49 }
 0x778   : > { %v1348_v31 = vpop.xlane.xlu2 %1347 }
 0x779   : > { %vm1349_vm13 = vcmp.eq.f32.partialorder %v1346_v13, %v1348_v31  ;;  %v1354_v61 = vcvt.f32.s32 %v1348_v31 }
 0x77a   : > { %v1350_v35 = vsel %vm1349_vm13, %v1345_v33, inf }
 0x77b   : > { %1351 = vmin.xlane.f32.xlu2 %v1350_v35  ;;  %v1355_v20 = vshll.u32 %v1354_v61, 16 }
 0x780   : > { %v1169_v39 = vpop.xlane.xlu2 %1168 }
 0x781   : > { %v1292_v38 = vperm.slane %v1169_v39, %v3111_v59 }
 0x783   : > { %v1299_v44 = vsel %vm1084_vm6, %v1292_v38, %v1298_v11 }
 0x784   : > { %v1300_v47 = vsel %vm1086_vm7, %v1293_v45, %v1299_v44 }
 0x785   : > { %v1301_v53 = vsel %vm1088_vm8, %v1294_v48, %v1300_v47  ;;  %v1505_v47 = vld [vmem:[#allocation10 + $0x18] sm:$0xff] }
 0x786   : > { %1522 = vmatpush.msrb.mxu3 %v1505_v47 }
 0x788   : > { %v1178_v14 = vpop.xlane.xlu2 %1177 }
 0x789   : > { %v1295_v22 = vperm.slane %v1178_v14, %v3111_v59  ;;  %v1504_v14 = vld [vmem:[#allocation10 + $0x10] sm:$0xff] }
 0x78a   : > { %1523 = vmatpush.msrb.mxu3 %v1504_v14 }
 0x78b   : > { %v1302_v15 = vsel %vm1090_vm9, %v1295_v22, %v1301_v53  ;;  %v1531_v22 = vld [vmem:[#allocation11 + $0x8] sm:$0xff] }
 0x78c   : > { %v1303_v32 = vsel %vm1092_vm10, %v1296_v52, %v1302_v15  ;;  %v1503_v52 = vld [vmem:[#allocation10 + $0x8] sm:$0xff]  ;;  %1569 = vmatpush.msra.mxu2 %v1531_v22 }
 0x78d   : > { %v1304_v57 = vsel %vm1094_vm11, %v1297_v54, %v1303_v32  ;;  %1524 = vmatpush.msrb.mxu3 %v1503_v52 }
 0x78e   : > { %v1332_v23 = vsel %vm1331_vm4, %v1304_v57, 0.0  ;;  %v1306_v58 = vsel %vm1281_vm15, %v1304_v57, 0.0 }
 0x78f   : > { %v1333_v60 = vsel %vm1097_vm12, %v1332_v23, 0.0  ;;  %v1307_v6 = vsel %vm1097_vm12, %v1306_v58, 0.0  ;;  %v1502_v23 = vld [vmem:[#allocation10] sm:$0xff] }
 0x790   : > { %1334 = vadd.xlane.f32.xlu1 %v1333_v60  ;;  %1308 = vadd.xlane.f32.xlu0 %v1307_v6 }
 0x791   : > { %1525 = vmatpush.msrb.mxu3 %v1502_v23 }
 0x7ee   : > { %v1352_v1 = vpop.xlane.xlu2 %1351 }
 0x7ef   : > { %v1353_v62 = vcvt.f32.s32 %v1352_v1 }
 0x7f1   : > { %v1356_v63 = vadd.s32 %v1355_v20, %v1353_v62 }
 0x7f3   : > { %vm1357_vm14 = vcmp.eq.s32.totalorder %v3111_v59, %v1356_v63  ;;  %v2191_v63 = vld [vmem:[%s2889_s7] sm:$0xff]  ;;  %s1941_s7 = sshll.u32 %s1673_s26, 3 }
 0x7f4   : > { %v1358_v3 = vsel %vm1357_vm14, %v1304_v57, 0.0  ;;  %v1530_v57 = vld [vmem:[#allocation11] sm:$0xff]  ;;  %1935 = vmatmul.msk.f32.vlgmr.msrb.gmra.mxu3 %vm702_vm0, %v2191_v63  ;;  %v2143_v63 = vld [vmem:[%s3436_s22] ss:$0 sm:$0xff] }
 0x7f5   : > { %v1359_v4 = vsel %vm1097_vm12, %v1358_v3, 0.0  ;;  %1570 = vmatpush.msra.mxu2 %v1530_v57 }
 0x7f6   : > { %1360 = vadd.xlane.f32.xlu2 %v1359_v4 }
 0x803   : > { %v1335_v18 = vpop.xlane.xlu1 %1334  ;;  %v1309_v5 = vpop.xlane.xlu0 %1308 }
 0x804   : > { %v1362_v7 = vmax.f32 %v1309_v5, %v1335_v18 }
 0x869   : > { %v1361_v8 = vpop.xlane.xlu2 %1360 }
 0x86a   : > { %v1363_v9 = vmax.f32 %v1362_v7, %v1361_v8 }
 0x86c   : > { %v1364_v10 = vsub.f32 %v1309_v5, %v1363_v9  ;;  %v1367_v12 = vsub.f32 %v1335_v18, %v1363_v9  ;;  %v1370_v13 = vsub.f32 %v1361_v8, %v1363_v9 }
 0x86e   : > { %v1365_v16 = vmul.f32 1.442695, %v1364_v10  ;;  %v1368_v17 = vmul.f32 1.442695, %v1367_v12  ;;  %v1371_v34 = vmul.f32 1.442695, %v1370_v13 }
 0x870   : > { %2177 = vpow2.f32 %v1365_v16 }
 0x871   : > { %2179 = vpow2.f32 %v1368_v17 }
 0x872   : > { %2181 = vpow2.f32 %v1371_v34 }
 0x876   : > { %v2178_v19 = vpop.eup %2177 }
 0x877   : > { %v2180_v24 = vpop.eup %2179  ;;  %v1376_v29 = vsel %vm1281_vm15, %v2178_v19, 0.0 }
 0x878   : > { %v1373_v25 = vadd.f32 %v2180_v24, %v2178_v19  ;;  %v2182_v26 = vpop.eup %2181  ;;  %v1377_v30 = vsel %vm1331_vm4, %v2180_v24, 0.0 }
 0x879   : > { %v1378_v31 = vadd.f32 %v1377_v30, %v1376_v29  ;;  %v1379_v33 = vsel %vm1357_vm14, %v2182_v26, 0.0 }
 0x87a   : > { %v1374_v27 = vadd.f32 %v2182_v26, %v1373_v25 }
 0x87b   : > { %v1380_v35 = vadd.f32 %v1379_v33, %v1378_v31 }
 0x87c   : > { %2183 = vrcp.f32 %v1374_v27 }
 0x882   : > { %v2184_v36 = vpop.eup %2183 }
 0x883   : > { %v1381_v37 = vmul.f32 %v2184_v36, %v1380_v35 }
 0x885   : > { %v1396_v21 = vperm.slane %v1381_v37, 2  ;;  %v1389_v39 = vperm.slane %v1381_v37, 1  ;;  %v1382_v41 = vperm.slane %v1381_v37, 0  ;;  %v1410_v0 = vperm.slane %v1381_v37, 4 }
 0x886   : > { %v1403_v38 = vperm.slane %v1381_v37, 3  ;;  %v1431_v11 = vperm.slane %v1381_v37, 7  ;;  %v1424_v56 = vperm.slane %v1381_v37, 6  ;;  %v1417_v44 = vperm.slane %v1381_v37, 5 }
 0x887   : > { %1401 = vperm.xlu2 %2139, %v1396_v21   ;;  %1394 = vperm.xlu1 %2138, %v1389_v39  }
 0x888   : > { %1387 = vperm.xlu0 %2137, %v1382_v41  }
 0x88f   : > { %1415 = vperm.xlu2 %2139, %v1410_v0   ;;  %1408 = vperm.xlu1 %2138, %v1403_v38  }
 0x890   : > { %1436 = vperm.xlu0 %2137, %v1431_v11  }
 0x897   : > { %1429 = vperm.xlu2 %2139, %v1424_v56   ;;  %1422 = vperm.xlu1 %2138, %v1417_v44  }
 0x8e1   : > { %v1402_v59 = vpop.permute.xlu2 %1401 }
 0x8e2   : > { %v1440_v48 = vmul.f32 %v1402_v59, %v3078_v46 }
 0x8e4   : > { %v1460_v58 = vsel %vm702_vm0, %v1440_v48, 0.0 }
 0x8e9   : > { %v1416_v45 = vpop.permute.xlu2 %1415 }
 0x8ea   : > { %v1442_v46 = vmul.f32 %v1416_v45, %v3092_v51 }
 0x8ec   : > { %v1474_v51 = vsel %vm702_vm0, %v1442_v46, 0.0 }
 0x8f1   : > { %v1430_v54 = vpop.permute.xlu2 %1429 }
 0x8f2   : > { %v1444_v61 = vmul.f32 %v1430_v54, %v3088_v50  ;;  %v1475_v50 = vrot.slane %v1474_v51, 4 }
 0x8f4   : > { %v1488_v4 = vsel %vm702_vm0, %v1444_v61, 0.0  ;;  %v1476_v26 = vadd.f32 %v1475_v50, %v1474_v51 }
 0x8f5   : > { %v1489_v13 = vrot.slane %v1488_v4, 4 }
 0x8f7   : > { %v1490_v30 = vadd.f32 %v1489_v13, %v1488_v4  ;;  %v1527_v4 = vpop.f32.mrf.mxu3 }
 0x8f9   : > { %v1395_v53 = vpop.permute.xlu1 %1394  ;;  %v1491_v41 = vrot.slane %v1490_v30, 2 }
 0x8fa   : > { %v1439_v15 = vmul.f32 %v1395_v53, %v3073_v43  ;;  %v1388_v32 = vpop.permute.xlu0 %1387  ;;  %v1461_v43 = vrot.slane %v1460_v58, 4 }
 0x8fb   : > { %v1438_v60 = vmul.f32 %v1388_v32, %v3068_v42  ;;  %v1492_v48 = vadd.f32 %v1491_v41, %v1490_v30 }
 0x8fc   : > { %v1453_v6 = vsel %vm702_vm0, %v1439_v15, 0.0  ;;  %v1462_v7 = vadd.f32 %v1461_v43, %v1460_v58 }
 0x8fd   : > { %v1454_v1 = vrot.slane %v1453_v6, 4  ;;  %v1446_v20 = vsel %vm702_vm0, %v1438_v60, 0.0  ;;  %v1493_v15 = vrot.slane %v1492_v48, 1 }
 0x8fe   : > { %v1447_v62 = vrot.slane %v1446_v20, 4  ;;  %v1463_v25 = vrot.slane %v1462_v7, 2 }
 0x8ff   : > { %v1455_v3 = vadd.f32 %v1454_v1, %v1453_v6  ;;  %v1494_v6 = vadd.f32 %v1493_v15, %v1492_v48 }
 0x900   : > { %v1448_v42 = vadd.f32 %v1447_v62, %v1446_v20  ;;  %v1464_v37 = vadd.f32 %v1463_v25, %v1462_v7 }
 0x901   : > { %v1456_v18 = vrot.slane %v1455_v3, 2  ;;  %v1409_v5 = vpop.permute.xlu1 %1408 }
 0x902   : > { %v1449_v8 = vrot.slane %v1448_v42, 2  ;;  %v1441_v9 = vmul.f32 %v1409_v5, %v3083_v2  ;;  %v1437_v10 = vpop.permute.xlu0 %1436  ;;  %v1465_v45 = vrot.slane %v1464_v37, 1 }
 0x903   : > { %v1445_v12 = vmul.f32 %v1437_v10, %v3098_v28  ;;  %v1457_v16 = vadd.f32 %v1456_v18, %v1455_v3  ;;  %v1477_v28 = vrot.slane %v1476_v26, 2 }
 0x904   : > { %v1467_v17 = vsel %vm702_vm0, %v1441_v9, 0.0  ;;  %v1450_v34 = vadd.f32 %v1449_v8, %v1448_v42  ;;  %v1466_v53 = vadd.f32 %v1465_v45, %v1464_v37  ;;  %v2142_v42 = vld [vmem:[%s3437_s11] ss:$0 sm:$0xff] }
 0x905   : > { %v1468_v19 = vrot.slane %v1467_v17, 4  ;;  %v1495_v24 = vsel %vm702_vm0, %v1445_v12, 0.0  ;;  %v1458_v31 = vrot.slane %v1457_v16, 1  ;;  %v1478_v40 = vadd.f32 %v1477_v28, %v1476_v26 }
 0x906   : > { %v1496_v27 = vrot.slane %v1495_v24, 4  ;;  %v1451_v33 = vrot.slane %v1450_v34, 1  ;;  %v1528_v18 = vadd.f32 %v2142_v42, %v1527_v4 }
 0x907   : > { %v1469_v29 = vadd.f32 %v1468_v19, %v1467_v17  ;;  %v1459_v0 = vadd.f32 %v1458_v31, %v1457_v16 }
 0x908   : > { %v1497_v2 = vadd.f32 %v1496_v27, %v1495_v24  ;;  %v1452_v11 = vadd.f32 %v1451_v33, %v1450_v34  ;;  %v1620_v33 = vld [vmem:[#allocation13 + $0x18] sm:$0xff] }
 0x909   : > { %v1470_v35 = vrot.slane %v1469_v29, 2  ;;  %v1423_v36 = vpop.permute.xlu1 %1422  ;;  %1642 = vmatpush.msra.mxu3 %v1620_v33 }
 0x90a   : > { %v1443_v21 = vmul.f32 %v1423_v36, %v3102_v55  ;;  %v1498_v44 = vrot.slane %v1497_v2, 2  ;;  %v1546_v49 = vsel %vm1082_vm1, %v1459_v0, %v1452_v11  ;;  %v1479_v55 = vrot.slane %v1478_v40, 1  ;;  %v1617_v36 = vld [vmem:[#allocation13] sm:$0xff]  ;;  %v2144_v11 = vld [vmem:[%s3442_s1] ss:$0 sm:$0xff] }
 0x90b   : > { %v1471_v39 = vadd.f32 %v1470_v35, %v1469_v29  ;;  %v1547_v32 = vsel %vm1084_vm6, %v1466_v53, %v1546_v49  ;;  %v1619_v35 = vld [vmem:[#allocation13 + $0x10] sm:$0xff] }
 0x90c   : > { %v1481_v38 = vsel %vm702_vm0, %v1443_v21, 0.0  ;;  %v1499_v22 = vadd.f32 %v1498_v44, %v1497_v2  ;;  %v1480_v46 = vadd.f32 %v1479_v55, %v1478_v40  ;;  %v1618_v2 = vld [vmem:[#allocation13 + $0x8] sm:$0xff]  ;;  %1643 = vmatpush.msra.mxu3 %v1619_v35 }
 0x90d   : > { %v1472_v56 = vrot.slane %v1471_v39, 1  ;;  %v1482_v59 = vrot.slane %v1481_v38, 4 }
 0x90e   : > { %v1500_v23 = vrot.slane %v1499_v22, 1  ;;  %1644 = vmatpush.msra.mxu3 %v1618_v2 }
 0x90f   : > { %v1483_v47 = vadd.f32 %v1482_v59, %v1481_v38  ;;  %v1473_v14 = vadd.f32 %v1472_v56, %v1471_v39 }
 0x910   : > { %v1501_v1 = vadd.f32 %v1500_v23, %v1499_v22  ;;  %1645 = vmatpush.msra.mxu3 %v1617_v36 }
 0x911   : > { %v1484_v52 = vrot.slane %v1483_v47, 2  ;;  %v1548_v57 = vsel %vm1086_vm7, %v1473_v14, %v1547_v32 }
 0x912   : > { %v1549_v61 = vsel %vm1088_vm8, %v1480_v46, %v1548_v57 }
 0x913   : > { %v1485_v54 = vadd.f32 %v1484_v52, %v1483_v47 }
 0x915   : > { %v1486_v58 = vrot.slane %v1485_v54, 1 }
 0x917   : > { %v1487_v60 = vadd.f32 %v1486_v58, %v1485_v54 }
 0x919   : > { %v1550_v20 = vsel %vm1090_vm9, %v1487_v60, %v1549_v61 }
 0x91a   : > { %v1551_v43 = vsel %vm1092_vm10, %v1494_v6, %v1550_v20 }
 0x91b   : > { %v1552_v62 = vsel %vm1094_vm11, %v1501_v1, %v1551_v43 }
 0x91c   : > { %1936 = vmatmul.msk.f32.vlgmr.msra.gmra.mxu2 %vm702_vm0, %v1552_v62 }
 0x99f   : > { %v1572_v51 = vpop.f32.mrf.mxu2 }
 0x9a0   : > { %v1573_v3 = vadd.f32 %v2143_v63, %v1572_v51 }
 0x9a2   : > { %1596 = vrot.lane.b32.xlu1 %v1573_v3, %s2573_s25  ;;  %v1575_v5 = vadd.f32 %v1573_v3, %v1528_v18 }
 0x9a4   : > { %v1937_v7 = vmul.f32 -1.442695, %v1575_v5 }
 0x9a6   : > { %2185 = vpow2.f32 %v1937_v7 }
 0x9aa   : > { %1612 = vrot.lane.b32.xlu1 %v1552_v62, %s2574_s16 }
 0x9ac   : > { %v2186_v50 = vpop.eup %2185 }
 0x9ad   : > { %v1579_v8 = vadd.f32 1.0, %v2186_v50 }
 0x9af   : > { %2187 = vrcp.f32 %v1579_v8  ;;  %v1591_v17 = vand.u32 2147483648, %v1579_v8  ;;  %vm1585_vm6 = vweird.f32 %v1579_v8  ;;  %v1589_v34 = vand.u32 2147483647, %v1579_v8 }
 0x9b1   : > { %v1592_v24 = vor.u32 1.1754944e-38, %v1591_v17  ;;  %vm1590_vm8 = vcmp.eq.f32.partialorder %v1589_v34, 8.507059e+37 }
 0x9b5   : > { %v2188_v9 = vpop.eup %2187 }
 0x9b6   : > { %v1581_v10 = vmul.f32 %v2188_v9, %v1579_v8  ;;  %vm1586_vm1 = vweird.f32 %v2188_v9 }
 0x9b7   : > { %vm1587_vm7 = vmor %vm1585_vm6, %vm1586_vm1 }
 0x9b8   : > { %v1582_v12 = vsub.f32 1.0, %v1581_v10 }
 0x9ba   : > { %v1583_v13 = vmul.f32 %v2188_v9, %v1582_v12 }
 0x9bc   : > { %v1584_v16 = vadd.f32 %v2188_v9, %v1583_v13 }
 0x9be   : > { %v1588_v19 = vsel %vm1587_vm7, %v2188_v9, %v1584_v16 }
 0x9bf   : > { %v1593_v26 = vsel %vm1590_vm8, %v1592_v24, %v1588_v19 }
 0x9c0   : > { %v1606_v28 = vsub.f32 1.0, %v1593_v26 }
 0xa14   : > { %v1597_v25 = vpop.permute.xlu1 %1596 }
 0xa15   : > { %v1599_v27 = vmul.f32 %v1597_v25, %v1593_v26 }
 0xa17   : > { %1601 = vrot.lane.b32.xlu2 %v1599_v27, %s2573_s25  ;;  %s3439_s25 = sld [smem:[#allocation47_spill]] }
 0xa1c   : > { %v1613_v37 = vpop.permute.xlu1 %1612 }
 0xa1d   : > { %v1615_v39 = vmul.f32 %v1613_v37, %v1593_v26  ;;  %s3440_s11 = smov %s3439_s25  ;;  %s1675_s28 = scalar_lea.hbm %s3439_s25, %s1941_s7 }
 0xa1e   : > { %s2422_s0 = scalar_lea.hbm %s3440_s11, 32 }
 0xa71   : > { %v1602_v29 = vpop.permute.xlu2 %1601 }
 0xa72   : > { %v1604_v30 = vadd.f32 %v1602_v29, %v1528_v18 }
 0xa74   : > { %2189 = vtanh.f32 %v1604_v30 }
 0xa7a   : > { %v2190_v31 = vpop.eup %2189 }
 0xa7b   : > { %1608 = vrot.lane.b32.xlu0 %v2190_v31, %s2575_s12 }
 0xaed   : > { %v1609_v21 = vpop.permute.xlu0 %1608 }
 0xaee   : > { %v1611_v41 = vmul.f32 %v1609_v21, %v1606_v28 }
 0xaf0   : > { %v1616_v0 = vadd.f32 %v1615_v39, %v1611_v41 }
 0xaf2   : > { %1626 = vrot.lane.b32.xlu2 %v1616_v0, %s2575_s12  ;;  %s1679_s12 = sshll.u32 %s1675_s28, 4  ;;  %s1680_s12 = int_to_ptr.hbm [resolvable:$true] %s1679_s12 }
 0xaf3   : > { %s2416_s9 = sshra.s32 %s1680_s12, 4  ;;  %s2417_s9 = int_to_ptr.hbm [resolvable:$true] %s2416_s9 }
 0xaf4   : > { %s2418_s18 = scalar_lea.hbm %s2417_s9, 8  ;;  %p2423_p9 = scmp.lt.s32.totalorder %s2417_s9, %s3440_s11 }
 0xaf5   : > { %p2419_p4 = scmp.ne.s32.totalorder %s2417_s9, %s2418_s18  ;;  %p2424_p12 = scmp.lt.s32.totalorder %s2422_s0, %s2418_s18 }
 0xaf7   : > { %p2420_p7 = pnand %p2419_p4, %p2731_p6  ;;  %p2425_p13 = por %p2424_p12, %p2423_p9 }
 0xaf9   : > { %p2421_p8 = pneg %p2420_p7 }
 0xafb   : > { %p2426_p2 = pnand %p2425_p13, %p2421_p8 }
 0xb4c   : > { %v1627_v38 = vpop.permute.xlu2 %1626 }
 0xb4d   : > { %1938 = vmatmul.msk.f32.vlgmr.msra.gmra.mxu3 %vm702_vm0, %v1627_v38 }
 0xbd0   : > { %v1647_v56 = vpop.f32.mrf.mxu3 }
 0xbd1   : > { %v1648_v44 = vadd.f32 %v2144_v11, %v1647_v56 }
 0xbd3   : > { %1650 = vst [vmem:[%s642_s2] sm:$0xff] %v1648_v44 }
 0xbd4   : > { %2429 = shalt.err (!%p2426_p2)
}
 0xbd5   : > { %1972 = dma.vmem_to_hbm [thread:$0]  (%p2731_p6), %s1678_s6, 128, %s1680_s12, %s1660_s15  }
 0xbd6 PF: > { %s3443_s2 = sld [smem:[#allocation21_spill]]  ;;  %p2010_p5 = scmp.ge.s32.totalorder %s2564_s21, 2 }
 0xbd7   : > { %s3444_s5 = sld [smem:[#allocation30_spill]] }
 0xbdc   : > { %s1702_s7 = sand.u32 1, %s3443_s2  }
 0xbdd   : > { %p3445_p10 = scmp.ne.s32.totalorder %s3444_s5, 0  ;;  %s1703_s4 = scalar_lea.sflag [#allocation4], %s1702_s7 }
 0xbdf   : > { %p1998_p1 = pnand %p2010_p5, %p3445_p10 }
 0xbe1   : > { %p1999_p3 = pneg %p1998_p1 }
 0xbe3   : > { %2507 = dma.done.wait (%p1999_p3), %s1703_s4, 128  }
 0xbe4   : > { %2509 = vsyncadd (%p1999_p3), %s1703_s4, 4294967168  ;;  %s35_s21 = sadd.s32 1, %s2564_s21   ;;  %s3447_s25 = sld [smem:[#allocation22_spill]] }
 0xbe5   : > { %p3296_p11 = scmp.ge.s32.totalorder %s35_s21, 6   ;;  %s3448_s14 = sld [smem:[#allocation23_spill]] }
 0xbe6   : > { %s3449_s15 = sld [smem:[#allocation24_spill]]  ;;  %s3452_s26 = smov %s2520_s27 }
 0xbe7   : > { %s3450_s16 = sld [smem:[#allocation34_spill]]  ;;  %s3453_s27 = smov %s2876_s3 }
 0xbe8   : > { %s3451_s6 = sld [smem:[#allocation32_spill]]  ;;  %s3454_s28 = smov %s2528_s29 }
 0xbe9   : > { %s3455_s29 = smov %s2532_s30  ;;  %s3456_s30 = smov %s2873_s17 }
 0xbea   : > { %s3457_s17 = smov %s2556_s19  ;;  %s3458_s18 = smov %s2560_s20 }
 0xbeb   : > { %s3460_s20 = smov %s3466_s13  ;;  %34 = sbr.rel (!%p3296_p11) target bundleno = 28 (0x1c), region = 168 }
 0xbee   : > { %s3459_s19 = smov %s3451_s6 }
 0xbf0   :  { %1709 = vsyncpa [#allocation3], 1 }
 0xbf1   :  { %1711 = vsyncpa [#allocation3 + $0x1], 1 }
 0xbf2   :  { %1712 = vsyncpa [#allocation6], 1 }
 0xbf3   :  { %1714 = vsyncpa [#allocation6 + $0x1], 1 }
 0xbf4   :  { %1715 = vsyncpa [#allocation9], 1 }
 0xbf5   :  { %1716 = vsyncpa [#allocation12], 1 }
 0xbf6   :  { %1717 = vsyncpa [#allocation4], 1 }
 0xbf7   :  { %1719 = vsyncpa [#allocation4 + $0x1], 1 }

</bundles_post_ra>
